<compile_context>
chip_gen: v6e
topology: v6e:2x2x1
jax: 0.10.0
libtpu: 0.0.40
codegen_flags: <defaults>
</compile_context>

<pallas_src>
import jax
import jax.numpy as jnp
from jax.experimental import pallas as pl
from jax.experimental.pallas import tpu as pltpu  # noqa: F401  (TPU backend assumed)

# ----------------------------- small config ---------------------------------
B, S = 2, 8                     # batch (per sentence), sequence length
B2 = 2 * B                      # both sentences fused along batch
BT = B2 * S                     # flattened token count
VOCAB, MAXPOS, NTYPES = 100, 32, 2
H, NUM_HEADS, INTER = 32, 2, 64     # hidden, heads, intermediate (mini-BERT)
HD = H // NUM_HEADS
NUM_LAYERS = 2
PROJ = 16                       # proj_dim (64 in the original module; small here)
NUM_CLASSES = 3
CLS_PAD = 128                   # lane-dense padded classifier width
PAD_ID = 0                      # bert_tokenizer.pad_token_id
LN_EPS = 1e-12
NEG_MASK = -10000.0             # BERT-style additive attention mask
INIT_STD = 0.02                 # bert_config.initializer_range

# packed weight-slab lane offsets: [wqkv | wo | w1 | w2^T]
_OFF_QKV, _OFF_WO, _OFF_W1, _OFF_W2, _SLAB_W = 0, 3 * H, 4 * H, 4 * H + INTER, 4 * H + 2 * INTER
_BIAS_PAD = 3 * H               # bias slab lane width (96)


# ----------------------------- in-kernel helpers -----------------------------
def _layer_norm(x, g, b):
    mu = jnp.mean(x, axis=-1, keepdims=True)
    var = jnp.mean((x - mu) ** 2, axis=-1, keepdims=True)
    return (x - mu) * jax.lax.rsqrt(var + LN_EPS) * g + b


def _dot_bt(a, b):
    # a @ b.T without materializing a transpose (MXU handles transposed rhs).
    return jax.lax.dot_general(a, b, (((1,), (1,)), ((), ())),
                               preferred_element_type=jnp.float32)


# ----------------------------- fused kernel ----------------------------------
def bert_nli_fused_kernel(
        emb_ref, mask_ref, eg_ref, eb_ref,
        wslab_ref, bslab_ref,
        pw_ref, pb_ref, prw_ref, prb_ref,
        wb_ref, teye_ref, smatcls_ref, cb_ref,
        out_ref):
    # ---- embedding LayerNorm ----
    x = _layer_norm(emb_ref[...], eg_ref[...], eb_ref[...])        # [BT, H] f32
    mask = mask_ref[...]                                           # [BT, BT] additive
    scale = 1.0 / (HD ** 0.5)

    # ---- transformer encoder (static layer loop, no grid) ----
    for l in range(NUM_LAYERS):
        wl = wslab_ref[l]                                          # [H, 256] bf16
        bl = bslab_ref[l]                                          # [8, 96]  f32
        wqkv = wl[:, _OFF_QKV:_OFF_WO]                             # [H, 3H]
        wo = wl[:, _OFF_WO:_OFF_W1]                                # [H, H]
        w1 = wl[:, _OFF_W1:_OFF_W2]                                # [H, INTER]
        w2t = wl[:, _OFF_W2:_SLAB_W]                               # [H, INTER] (= w2^T)
        bqkv = bl[0:1, 0:3 * H]
        bo = bl[1:2, 0:H]
        ln1g, ln1b = bl[2:3, 0:H], bl[3:4, 0:H]
        b1 = bl[4:5, 0:INTER]
        b2 = bl[5:6, 0:H]
        ln2g, ln2b = bl[6:7, 0:H], bl[7:8, 0:H]

        xb = x.astype(jnp.bfloat16)
        qkv = jnp.dot(xb, wqkv, preferred_element_type=jnp.float32) + bqkv   # [BT, 3H]

        attn = jnp.zeros((BT, H), jnp.float32)
        for hh in range(NUM_HEADS):                                # tiny static loop
            qh = qkv[:, hh * HD:(hh + 1) * HD].astype(jnp.bfloat16)           # [BT, HD]
            kh = qkv[:, H + hh * HD:H + (hh + 1) * HD].astype(jnp.bfloat16)
            vh = qkv[:, 2 * H + hh * HD:2 * H + (hh + 1) * HD].astype(jnp.bfloat16)
            # full [BT, BT] scores; cross-sequence / pad keys killed by mask
            s = _dot_bt(qh, kh) * scale + mask
            s = s - jnp.max(s, axis=-1, keepdims=True)
            p = jnp.exp(s)
            p = p * pl.reciprocal(jnp.sum(p, axis=-1, keepdims=True), approx=True)
            ctx = jnp.dot(p.astype(jnp.bfloat16), vh,
                          preferred_element_type=jnp.float32)                 # [BT, HD]
            attn = attn + jnp.dot(ctx.astype(jnp.bfloat16),
                                  wo[hh * HD:(hh + 1) * HD, :],
                                  preferred_element_type=jnp.float32)
        attn = attn + bo
        h1 = _layer_norm(x + attn, ln1g, ln1b)

        # TODO(synk): HF BERT uses erf-based GELU; tanh approximation used here.
        ff = jax.nn.gelu(jnp.dot(h1.astype(jnp.bfloat16), w1,
                                 preferred_element_type=jnp.float32) + b1,
                         approximate=True)
        ff = jax.lax.dot_general(ff.astype(jnp.bfloat16), w2t,
                                 (((1,), (1,)), ((), ())),
                                 preferred_element_type=jnp.float32) + b2
        x = _layer_norm(h1 + ff, ln2g, ln2b)

    # ---- pooler + embd_proj + bilinear (+fused classifier) + log_softmax ----
    cls = x.reshape(B2, S, H)[:, 0, :]                             # [CLS] rows, [B2, H]
    pooled = jnp.tanh(jnp.dot(cls.astype(jnp.bfloat16), pw_ref[...],
                              preferred_element_type=jnp.float32) + pb_ref[...])
    # dropout is identity in eval mode
    proj_all = jnp.dot(pooled.astype(jnp.bfloat16), prw_ref[...],
                       preferred_element_type=jnp.float32) + prb_ref[...]      # [B2, PROJ]
    c1 = proj_all[:B, :]                                           # sentence-1 projections
    c2 = proj_all[B:, :]                                           # sentence-2 projections
    # Bilinear: bil[b,k] = c1[b] @ W[k] @ c2[b], classifier folded into smatcls
    #   wb      : [in1, out*in2] with wb[i, k*P+j] = W[k,i,j]
    #   teye    : [in2, out*in2] replicates c2 over k-blocks
    #   smatcls : [out*in2, 128] = block-sum matrix @ padded classifier weight
    t = jnp.dot(c1, wb_ref[...], preferred_element_type=jnp.float32)           # [B, P*P]
    c2t = jnp.dot(c2, teye_ref[...], preferred_element_type=jnp.float32)       # [B, P*P]
    logits = jnp.dot(t * c2t, smatcls_ref[...],
                     preferred_element_type=jnp.float32) + cb_ref[...]         # [B, 128]
    m = jnp.max(logits, axis=-1, keepdims=True)
    lse = m + jnp.log(jnp.sum(jnp.exp(logits - m), axis=-1, keepdims=True))
    out_ref[...] = logits - lse


# ----------------------------- cost estimate ----------------------------------
def _cost_estimate(inputs):
    per_layer = (2 * BT * H * 3 * H                                   # fused QKV
                 + NUM_HEADS * (2 * BT * BT * HD * 2 + 2 * BT * HD * H)  # attn + out proj
                 + 2 * BT * H * INTER * 2)                            # FFN
    head = (2 * B2 * H * H + 2 * B2 * H * PROJ
            + 2 * B * PROJ * PROJ * PROJ * 2 + 2 * B * PROJ * PROJ * CLS_PAD)
    flops = NUM_LAYERS * per_layer + head
    transcendentals = (NUM_LAYERS * (NUM_HEADS * BT * BT + BT * INTER)
                       + B2 * H + 2 * B * CLS_PAD)
    bytes_accessed = sum(int(a.size) * a.dtype.itemsize for a in inputs) + B * CLS_PAD * 4
    return pl.CostEstimate(flops=flops, transcendentals=transcendentals,
                           bytes_accessed=bytes_accessed)


# ----------------------------- forward ----------------------------------------
@jax.jit
def bert_nli_forward(prep, input_ids1, input_ids2):
    ids = jnp.concatenate([input_ids1, input_ids2], axis=0)              # [B2, S]
    emb = (prep['word_emb'][ids]
           + prep['pos_emb'][None, :S, :]
           + prep['type_emb'][0][None, None, :])
    emb2d = emb.reshape(BT, H).astype(jnp.float32)

    # combined block-diagonal (per-sequence) + key-padding additive mask, hoisted once
    ids_flat = ids.reshape(BT)
    seq_id = jnp.arange(BT) // S
    allowed = (seq_id[:, None] == seq_id[None, :]) & (ids_flat != PAD_ID)[None, :]
    mask_full = jnp.where(allowed, 0.0, NEG_MASK).astype(jnp.float32)     # [BT, BT]

    inputs = (emb2d, mask_full, prep['emb_ln_g'], prep['emb_ln_b'],
              prep['wslab'], prep['bslab'],
              prep['pooler_w'], prep['pooler_b'], prep['proj_w'], prep['proj_b'],
              prep['bil_w2d'], prep['tile_eye'], prep['smat_cls'], prep['cls_b_pad'])

    logp_pad = pl.pallas_call(
        bert_nli_fused_kernel,
        out_shape=jax.ShapeDtypeStruct((B, CLS_PAD), jnp.float32),
        cost_estimate=_cost_estimate(inputs),
    )(*inputs)

    logp = logp_pad[:, :NUM_CLASSES]
    score = jnp.exp(jnp.max(logp, axis=1))               # score = exp(max log_softmax)
    pred = jnp.argmax(logp, axis=1).astype(jnp.int32)    # first-max, like torch.max
    return score, pred


# ----------------------------- parameter init / prep --------------------------
def init_params(key):
    def nrm(k, shape):
        return (INIT_STD * jax.random.normal(k, shape)).astype(jnp.float32)

    keys = iter(jax.random.split(key, 64))
    p = {
        'word_emb': nrm(next(keys), (VOCAB, H)),
        'pos_emb': nrm(next(keys), (MAXPOS, H)),
        'type_emb': nrm(next(keys), (NTYPES, H)),
        'emb_ln_g': jnp.ones((1, H), jnp.float32),
        'emb_ln_b': jnp.zeros((1, H), jnp.float32),
        'pooler_w': nrm(next(keys), (H, H)),
        'pooler_b': jnp.zeros((1, H), jnp.float32),
        'proj_w': nrm(next(keys), (H, PROJ)),              # embd_proj
        'proj_b': jnp.zeros((1, PROJ), jnp.float32),
        'bil_w': nrm(next(keys), (PROJ, PROJ, PROJ)),      # nn.Bilinear [out,in1,in2]
        'cls_w': nrm(next(keys), (PROJ, NUM_CLASSES)),
        'cls_b': jnp.zeros((1, NUM_CLASSES), jnp.float32),
        'layers': [],
    }
    for _ in range(NUM_LAYERS):
        p['layers'].append({
            'wq': nrm(next(keys), (H, H)), 'bq': jnp.zeros((1, H), jnp.float32),
            'wk': nrm(next(keys), (H, H)), 'bk': jnp.zeros((1, H), jnp.float32),
            'wv': nrm(next(keys), (H, H)), 'bv': jnp.zeros((1, H), jnp.float32),
            'wo': nrm(next(keys), (H, H)), 'bo': jnp.zeros((1, H), jnp.float32),
            'ln1_g': jnp.ones((1, H), jnp.float32), 'ln1_b': jnp.zeros((1, H), jnp.float32),
            'w1': nrm(next(keys), (H, INTER)), 'b1': jnp.zeros((1, INTER), jnp.float32),
            'w2': nrm(next(keys), (INTER, H)), 'b2': jnp.zeros((1, H), jnp.float32),
            'ln2_g': jnp.ones((1, H), jnp.float32), 'ln2_b': jnp.zeros((1, H), jnp.float32),
        })
    return p


def prepare_params(p):
    f32, bf16 = jnp.float32, jnp.bfloat16

    def pad96(v):   # [1, w] -> [1, 96]
        return jnp.pad(v, ((0, 0), (0, _BIAS_PAD - v.shape[1])))

    wslab_layers, bslab_layers = [], []
    for lyr in p['layers']:
        # bf16 weight slab row-32 layout: [wqkv | wo | w1 | w2^T]  -> [H, 256]
        wslab_layers.append(jnp.concatenate([
            jnp.concatenate([lyr['wq'], lyr['wk'], lyr['wv']], axis=1),
            lyr['wo'], lyr['w1'], lyr['w2'].T], axis=1))
        # f32 bias/LN slab, one vector per sublane row -> [8, 96]
        bslab_layers.append(jnp.concatenate([
            pad96(jnp.concatenate([lyr['bq'], lyr['bk'], lyr['bv']], axis=1)),
            pad96(lyr['bo']), pad96(lyr['ln1_g']), pad96(lyr['ln1_b']),
            pad96(lyr['b1']), pad96(lyr['b2']), pad96(lyr['ln2_g']), pad96(lyr['ln2_b'])],
            axis=0))

    # bilinear block-sum matrix fused with the 128-lane padded classifier weight
    sum_mat = jnp.repeat(jnp.eye(PROJ, dtype=f32), PROJ, axis=0)           # [P*P, P]
    cls_w_pad = jnp.zeros((PROJ, CLS_PAD), f32).at[:, :NUM_CLASSES].set(p['cls_w'])

    prep = {
        'word_emb': p['word_emb'], 'pos_emb': p['pos_emb'], 'type_emb': p['type_emb'],
        'emb_ln_g': p['emb_ln_g'], 'emb_ln_b': p['emb_ln_b'],
        'wslab': jnp.stack(wslab_layers, axis=0).astype(bf16),             # [L, H, 256]
        'bslab': jnp.stack(bslab_layers, axis=0).astype(f32),              # [L, 8, 96]
        'pooler_w': p['pooler_w'].astype(bf16), 'pooler_b': p['pooler_b'],
        'proj_w': p['proj_w'].astype(bf16), 'proj_b': p['proj_b'],
        # bilinear reshaped to 2-D: wb2[i, k*P+j] = bil_w[k, i, j]
        'bil_w2d': jnp.transpose(p['bil_w'], (1, 0, 2)).reshape(PROJ, PROJ * PROJ),
        'tile_eye': jnp.tile(jnp.eye(PROJ, dtype=f32), (1, PROJ)),         # [P, P*P]
        'smat_cls': jnp.dot(sum_mat, cls_w_pad),                           # [P*P, 128]
        # classifier bias padded to 128 lanes; pad columns get a -1e9 bias
        'cls_b_pad': jnp.full((1, CLS_PAD), -1e9, f32).at[:, :NUM_CLASSES].set(p['cls_b']),
    }
    return prep


# ----------------------------- main ------------------------------------------
if __name__ == "__main__":
    root = jax.random.PRNGKey(0)
    kp, k1, k2 = jax.random.split(root, 3)

    params = init_params(kp)
    prep = prepare_params(params)

    input_ids1 = jax.random.randint(k1, (B, S), 1, VOCAB, dtype=jnp.int32)
    input_ids2 = jax.random.randint(k2, (B, S), 1, VOCAB, dtype=jnp.int32)
    # add some padding tokens to exercise the attention mask
    input_ids1 = input_ids1.at[1, S - 2:].set(PAD_ID)
    input_ids2 = input_ids2.at[0, S - 3:].set(PAD_ID)

    score, pred = bert_nli_forward(prep, input_ids1, input_ids2)
    jax.block_until_ready((score, pred))
    print("KERNEL_OK")
</pallas_src>

<mosaic_0001>
module attributes {stable_mosaic.version = 11 : i64} {
  func.func @bert_nli_fused_kernel(%arg0: memref<32x32xf32, #tpu.memory_space<vmem>>, %arg1: memref<32x32xf32, #tpu.memory_space<vmem>>, %arg2: memref<1x32xf32, #tpu.memory_space<vmem>>, %arg3: memref<1x32xf32, #tpu.memory_space<vmem>>, %arg4: memref<2x32x256xbf16, #tpu.memory_space<vmem>>, %arg5: memref<2x8x96xf32, #tpu.memory_space<vmem>>, %arg6: memref<32x32xbf16, #tpu.memory_space<vmem>>, %arg7: memref<1x32xf32, #tpu.memory_space<vmem>>, %arg8: memref<32x16xbf16, #tpu.memory_space<vmem>>, %arg9: memref<1x16xf32, #tpu.memory_space<vmem>>, %arg10: memref<16x256xf32, #tpu.memory_space<vmem>>, %arg11: memref<16x256xf32, #tpu.memory_space<vmem>>, %arg12: memref<256x128xf32, #tpu.memory_space<vmem>>, %arg13: memref<1x128xf32, #tpu.memory_space<vmem>>, %arg14: memref<2x128xf32, #tpu.memory_space<vmem>>) attributes {dimension_semantics = [], scalar_prefetch = 0 : i64, scratch_operands = 0 : i64, tpu.core_type = #tpu.core_type<tc>} {
    %c0 = arith.constant 0 : index
    %c0_0 = arith.constant 0 : index
    %0 = vector.load %arg0[%c0, %c0_0] : memref<32x32xf32, #tpu.memory_space<vmem>>, vector<32x32xf32>
    %c0_1 = arith.constant 0 : index
    %c0_2 = arith.constant 0 : index
    %1 = vector.load %arg2[%c0_1, %c0_2] : memref<1x32xf32, #tpu.memory_space<vmem>>, vector<1x32xf32>
    %c0_3 = arith.constant 0 : index
    %c0_4 = arith.constant 0 : index
    %2 = vector.load %arg3[%c0_3, %c0_4] : memref<1x32xf32, #tpu.memory_space<vmem>>, vector<1x32xf32>
    %cst = arith.constant dense<0.000000e+00> : vector<32xf32>
    %3 = vector.multi_reduction <add>, %0, %cst [1] : vector<32x32xf32> to vector<32xf32>
    %4 = vector.shape_cast %3 : vector<32xf32> to vector<32x1xf32>
    %cst_5 = arith.constant 3.200000e+01 : f32
    %5 = vector.broadcast %cst_5 : f32 to vector<32x1xf32>
    %6 = arith.divf %4, %5 : vector<32x1xf32>
    %7 = vector.broadcast %6 : vector<32x1xf32> to vector<32x32xf32>
    %8 = arith.subf %0, %7 : vector<32x32xf32>
    %9 = arith.mulf %8, %8 : vector<32x32xf32>
    %cst_6 = arith.constant dense<0.000000e+00> : vector<32xf32>
    %10 = vector.multi_reduction <add>, %9, %cst_6 [1] : vector<32x32xf32> to vector<32xf32>
    %11 = vector.shape_cast %10 : vector<32xf32> to vector<32x1xf32>
    %cst_7 = arith.constant 3.200000e+01 : f32
    %12 = vector.broadcast %cst_7 : f32 to vector<32x1xf32>
    %13 = arith.divf %11, %12 : vector<32x1xf32>
    %14 = vector.broadcast %6 : vector<32x1xf32> to vector<32x32xf32>
    %15 = arith.subf %0, %14 : vector<32x32xf32>
    %cst_8 = arith.constant 9.99999996E-13 : f32
    %16 = vector.broadcast %cst_8 : f32 to vector<32x1xf32>
    %17 = arith.addf %13, %16 : vector<32x1xf32>
    %18 = math.rsqrt %17 : vector<32x1xf32>
    %19 = vector.broadcast %18 : vector<32x1xf32> to vector<32x32xf32>
    %20 = arith.mulf %15, %19 : vector<32x32xf32>
    %21 = vector.broadcast %1 : vector<1x32xf32> to vector<32x32xf32>
    %22 = arith.mulf %20, %21 : vector<32x32xf32>
    %23 = vector.broadcast %2 : vector<1x32xf32> to vector<32x32xf32>
    %24 = arith.addf %22, %23 : vector<32x32xf32>
    %c0_9 = arith.constant 0 : index
    %c0_10 = arith.constant 0 : index
    %25 = vector.load %arg1[%c0_9, %c0_10] : memref<32x32xf32, #tpu.memory_space<vmem>>, vector<32x32xf32>
    %c0_11 = arith.constant 0 : index
    %c0_12 = arith.constant 0 : index
    %c0_13 = arith.constant 0 : index
    %26 = vector.load %arg4[%c0_11, %c0_12, %c0_13] : memref<2x32x256xbf16, #tpu.memory_space<vmem>>, vector<1x32x256xbf16>
    %27 = vector.shape_cast %26 : vector<1x32x256xbf16> to vector<32x256xbf16>
    %c0_14 = arith.constant 0 : index
    %c0_15 = arith.constant 0 : index
    %c0_16 = arith.constant 0 : index
    %28 = vector.load %arg5[%c0_14, %c0_15, %c0_16] : memref<2x8x96xf32, #tpu.memory_space<vmem>>, vector<1x8x96xf32>
    %29 = vector.shape_cast %28 : vector<1x8x96xf32> to vector<8x96xf32>
    %30 = vector.extract_strided_slice %27 {offsets = [0, 0], sizes = [32, 96], strides = [1, 1]} : vector<32x256xbf16> to vector<32x96xbf16>
    %31 = vector.extract_strided_slice %27 {offsets = [0, 96], sizes = [32, 32], strides = [1, 1]} : vector<32x256xbf16> to vector<32x32xbf16>
    %32 = vector.extract_strided_slice %27 {offsets = [0, 128], sizes = [32, 64], strides = [1, 1]} : vector<32x256xbf16> to vector<32x64xbf16>
    %33 = vector.extract_strided_slice %27 {offsets = [0, 192], sizes = [32, 64], strides = [1, 1]} : vector<32x256xbf16> to vector<32x64xbf16>
    %34 = vector.extract_strided_slice %29 {offsets = [0, 0], sizes = [1, 96], strides = [1, 1]} : vector<8x96xf32> to vector<1x96xf32>
    %35 = vector.extract_strided_slice %29 {offsets = [1, 0], sizes = [1, 32], strides = [1, 1]} : vector<8x96xf32> to vector<1x32xf32>
    %36 = vector.extract_strided_slice %29 {offsets = [2, 0], sizes = [1, 32], strides = [1, 1]} : vector<8x96xf32> to vector<1x32xf32>
    %37 = vector.extract_strided_slice %29 {offsets = [3, 0], sizes = [1, 32], strides = [1, 1]} : vector<8x96xf32> to vector<1x32xf32>
    %38 = vector.extract_strided_slice %29 {offsets = [4, 0], sizes = [1, 64], strides = [1, 1]} : vector<8x96xf32> to vector<1x64xf32>
    %39 = vector.extract_strided_slice %29 {offsets = [5, 0], sizes = [1, 32], strides = [1, 1]} : vector<8x96xf32> to vector<1x32xf32>
    %40 = vector.extract_strided_slice %29 {offsets = [6, 0], sizes = [1, 32], strides = [1, 1]} : vector<8x96xf32> to vector<1x32xf32>
    %41 = vector.extract_strided_slice %29 {offsets = [7, 0], sizes = [1, 32], strides = [1, 1]} : vector<8x96xf32> to vector<1x32xf32>
    %42 = arith.truncf %24 : vector<32x32xf32> to vector<32x32xbf16>
    %cst_17 = arith.constant dense<0.000000e+00> : vector<32x96xf32>
    %43 = tpu.matmul %42, %30, %cst_17 {dimension_numbers = #tpu.dot_dimension_numbers<[1], [0], [0], [1], [0, 0, 1, 1], [], []>} : vector<32x32xbf16>, vector<32x96xbf16>, vector<32x96xf32> -> vector<32x96xf32>
    %44 = vector.broadcast %34 : vector<1x96xf32> to vector<32x96xf32>
    %45 = arith.addf %43, %44 : vector<32x96xf32>
    %cst_18 = arith.constant 0.000000e+00 : f32
    %46 = vector.broadcast %cst_18 : f32 to vector<32x32xf32>
    %47 = vector.extract_strided_slice %45 {offsets = [0, 0], sizes = [32, 16], strides = [1, 1]} : vector<32x96xf32> to vector<32x16xf32>
    %48 = arith.truncf %47 : vector<32x16xf32> to vector<32x16xbf16>
    %49 = vector.extract_strided_slice %45 {offsets = [0, 32], sizes = [32, 16], strides = [1, 1]} : vector<32x96xf32> to vector<32x16xf32>
    %50 = arith.truncf %49 : vector<32x16xf32> to vector<32x16xbf16>
    %51 = vector.extract_strided_slice %45 {offsets = [0, 64], sizes = [32, 16], strides = [1, 1]} : vector<32x96xf32> to vector<32x16xf32>
    %52 = arith.truncf %51 : vector<32x16xf32> to vector<32x16xbf16>
    %cst_19 = arith.constant dense<0.000000e+00> : vector<32x32xf32>
    %53 = tpu.matmul %48, %50, %cst_19 {dimension_numbers = #tpu.dot_dimension_numbers<[1], [1], [0], [0], [0, 0, 1, 0], [], []>} : vector<32x16xbf16>, vector<32x16xbf16>, vector<32x32xf32> -> vector<32x32xf32>
    %cst_20 = arith.constant 2.500000e-01 : f32
    %54 = vector.broadcast %cst_20 : f32 to vector<32x32xf32>
    %55 = arith.mulf %53, %54 : vector<32x32xf32>
    %56 = arith.addf %55, %25 : vector<32x32xf32>
    %cst_21 = arith.constant dense<0xFF800000> : vector<32xf32>
    %57 = vector.multi_reduction <maximumf>, %56, %cst_21 [1] : vector<32x32xf32> to vector<32xf32>
    %58 = vector.shape_cast %57 : vector<32xf32> to vector<32x1xf32>
    %59 = vector.broadcast %58 : vector<32x1xf32> to vector<32x32xf32>
    %60 = arith.subf %56, %59 : vector<32x32xf32>
    %61 = math.exp %60 : vector<32x32xf32>
    %cst_22 = arith.constant dense<0.000000e+00> : vector<32xf32>
    %62 = vector.multi_reduction <add>, %61, %cst_22 [1] : vector<32x32xf32> to vector<32xf32>
    %63 = vector.shape_cast %62 : vector<32xf32> to vector<32x1xf32>
    %64 = tpu.reciprocal %63 {approx = true} : vector<32x1xf32> -> vector<32x1xf32>
    %65 = vector.broadcast %64 : vector<32x1xf32> to vector<32x32xf32>
    %66 = arith.mulf %61, %65 : vector<32x32xf32>
    %67 = arith.truncf %66 : vector<32x32xf32> to vector<32x32xbf16>
    %cst_23 = arith.constant dense<0.000000e+00> : vector<32x16xf32>
    %68 = tpu.matmul %67, %52, %cst_23 {dimension_numbers = #tpu.dot_dimension_numbers<[1], [0], [0], [1], [0, 0, 1, 1], [], []>} : vector<32x32xbf16>, vector<32x16xbf16>, vector<32x16xf32> -> vector<32x16xf32>
    %69 = arith.truncf %68 : vector<32x16xf32> to vector<32x16xbf16>
    %70 = vector.extract_strided_slice %31 {offsets = [0, 0], sizes = [16, 32], strides = [1, 1]} : vector<32x32xbf16> to vector<16x32xbf16>
    %cst_24 = arith.constant dense<0.000000e+00> : vector<32x32xf32>
    %71 = tpu.matmul %69, %70, %cst_24 {dimension_numbers = #tpu.dot_dimension_numbers<[1], [0], [0], [1], [0, 0, 1, 1], [], []>} : vector<32x16xbf16>, vector<16x32xbf16>, vector<32x32xf32> -> vector<32x32xf32>
    %72 = arith.addf %46, %71 : vector<32x32xf32>
    %73 = vector.extract_strided_slice %45 {offsets = [0, 16], sizes = [32, 16], strides = [1, 1]} : vector<32x96xf32> to vector<32x16xf32>
    %74 = arith.truncf %73 : vector<32x16xf32> to vector<32x16xbf16>
    %75 = vector.extract_strided_slice %45 {offsets = [0, 48], sizes = [32, 16], strides = [1, 1]} : vector<32x96xf32> to vector<32x16xf32>
    %76 = arith.truncf %75 : vector<32x16xf32> to vector<32x16xbf16>
    %77 = vector.extract_strided_slice %45 {offsets = [0, 80], sizes = [32, 16], strides = [1, 1]} : vector<32x96xf32> to vector<32x16xf32>
    %78 = arith.truncf %77 : vector<32x16xf32> to vector<32x16xbf16>
    %cst_25 = arith.constant dense<0.000000e+00> : vector<32x32xf32>
    %79 = tpu.matmul %74, %76, %cst_25 {dimension_numbers = #tpu.dot_dimension_numbers<[1], [1], [0], [0], [0, 0, 1, 0], [], []>} : vector<32x16xbf16>, vector<32x16xbf16>, vector<32x32xf32> -> vector<32x32xf32>
    %cst_26 = arith.constant 2.500000e-01 : f32
    %80 = vector.broadcast %cst_26 : f32 to vector<32x32xf32>
    %81 = arith.mulf %79, %80 : vector<32x32xf32>
    %82 = arith.addf %81, %25 : vector<32x32xf32>
    %cst_27 = arith.constant dense<0xFF800000> : vector<32xf32>
    %83 = vector.multi_reduction <maximumf>, %82, %cst_27 [1] : vector<32x32xf32> to vector<32xf32>
    %84 = vector.shape_cast %83 : vector<32xf32> to vector<32x1xf32>
    %85 = vector.broadcast %84 : vector<32x1xf32> to vector<32x32xf32>
    %86 = arith.subf %82, %85 : vector<32x32xf32>
    %87 = math.exp %86 : vector<32x32xf32>
    %cst_28 = arith.constant dense<0.000000e+00> : vector<32xf32>
    %88 = vector.multi_reduction <add>, %87, %cst_28 [1] : vector<32x32xf32> to vector<32xf32>
    %89 = vector.shape_cast %88 : vector<32xf32> to vector<32x1xf32>
    %90 = tpu.reciprocal %89 {approx = true} : vector<32x1xf32> -> vector<32x1xf32>
    %91 = vector.broadcast %90 : vector<32x1xf32> to vector<32x32xf32>
    %92 = arith.mulf %87, %91 : vector<32x32xf32>
    %93 = arith.truncf %92 : vector<32x32xf32> to vector<32x32xbf16>
    %cst_29 = arith.constant dense<0.000000e+00> : vector<32x16xf32>
    %94 = tpu.matmul %93, %78, %cst_29 {dimension_numbers = #tpu.dot_dimension_numbers<[1], [0], [0], [1], [0, 0, 1, 1], [], []>} : vector<32x32xbf16>, vector<32x16xbf16>, vector<32x16xf32> -> vector<32x16xf32>
    %95 = arith.truncf %94 : vector<32x16xf32> to vector<32x16xbf16>
    %96 = vector.extract_strided_slice %31 {offsets = [16, 0], sizes = [16, 32], strides = [1, 1]} : vector<32x32xbf16> to vector<16x32xbf16>
    %cst_30 = arith.constant dense<0.000000e+00> : vector<32x32xf32>
    %97 = tpu.matmul %95, %96, %cst_30 {dimension_numbers = #tpu.dot_dimension_numbers<[1], [0], [0], [1], [0, 0, 1, 1], [], []>} : vector<32x16xbf16>, vector<16x32xbf16>, vector<32x32xf32> -> vector<32x32xf32>
    %98 = arith.addf %72, %97 : vector<32x32xf32>
    %99 = vector.broadcast %35 : vector<1x32xf32> to vector<32x32xf32>
    %100 = arith.addf %98, %99 : vector<32x32xf32>
    %101 = arith.addf %24, %100 : vector<32x32xf32>
    %cst_31 = arith.constant dense<0.000000e+00> : vector<32xf32>
    %102 = vector.multi_reduction <add>, %101, %cst_31 [1] : vector<32x32xf32> to vector<32xf32>
    %103 = vector.shape_cast %102 : vector<32xf32> to vector<32x1xf32>
    %cst_32 = arith.constant 3.200000e+01 : f32
    %104 = vector.broadcast %cst_32 : f32 to vector<32x1xf32>
    %105 = arith.divf %103, %104 : vector<32x1xf32>
    %106 = vector.broadcast %105 : vector<32x1xf32> to vector<32x32xf32>
    %107 = arith.subf %101, %106 : vector<32x32xf32>
    %108 = arith.mulf %107, %107 : vector<32x32xf32>
    %cst_33 = arith.constant dense<0.000000e+00> : vector<32xf32>
    %109 = vector.multi_reduction <add>, %108, %cst_33 [1] : vector<32x32xf32> to vector<32xf32>
    %110 = vector.shape_cast %109 : vector<32xf32> to vector<32x1xf32>
    %cst_34 = arith.constant 3.200000e+01 : f32
    %111 = vector.broadcast %cst_34 : f32 to vector<32x1xf32>
    %112 = arith.divf %110, %111 : vector<32x1xf32>
    %113 = vector.broadcast %105 : vector<32x1xf32> to vector<32x32xf32>
    %114 = arith.subf %101, %113 : vector<32x32xf32>
    %cst_35 = arith.constant 9.99999996E-13 : f32
    %115 = vector.broadcast %cst_35 : f32 to vector<32x1xf32>
    %116 = arith.addf %112, %115 : vector<32x1xf32>
    %117 = math.rsqrt %116 : vector<32x1xf32>
    %118 = vector.broadcast %117 : vector<32x1xf32> to vector<32x32xf32>
    %119 = arith.mulf %114, %118 : vector<32x32xf32>
    %120 = vector.broadcast %36 : vector<1x32xf32> to vector<32x32xf32>
    %121 = arith.mulf %119, %120 : vector<32x32xf32>
    %122 = vector.broadcast %37 : vector<1x32xf32> to vector<32x32xf32>
    %123 = arith.addf %121, %122 : vector<32x32xf32>
    %124 = arith.truncf %123 : vector<32x32xf32> to vector<32x32xbf16>
    %cst_36 = arith.constant dense<0.000000e+00> : vector<32x64xf32>
    %125 = tpu.matmul %124, %32, %cst_36 {dimension_numbers = #tpu.dot_dimension_numbers<[1], [0], [0], [1], [0, 0, 1, 1], [], []>} : vector<32x32xbf16>, vector<32x64xbf16>, vector<32x64xf32> -> vector<32x64xf32>
    %126 = vector.broadcast %38 : vector<1x64xf32> to vector<32x64xf32>
    %127 = arith.addf %125, %126 : vector<32x64xf32>
    %128 = arith.mulf %127, %127 : vector<32x64xf32>
    %129 = arith.mulf %127, %128 : vector<32x64xf32>
    %cst_37 = arith.constant 4.471500e-02 : f32
    %130 = vector.broadcast %cst_37 : f32 to vector<32x64xf32>
    %131 = arith.mulf %130, %129 : vector<32x64xf32>
    %132 = arith.addf %127, %131 : vector<32x64xf32>
    %cst_38 = arith.constant 0.797884583 : f32
    %133 = vector.broadcast %cst_38 : f32 to vector<32x64xf32>
    %134 = arith.mulf %133, %132 : vector<32x64xf32>
    %135 = math.tanh %134 : vector<32x64xf32>
    %cst_39 = arith.constant 1.000000e+00 : f32
    %136 = vector.broadcast %cst_39 : f32 to vector<32x64xf32>
    %137 = arith.addf %136, %135 : vector<32x64xf32>
    %cst_40 = arith.constant 5.000000e-01 : f32
    %138 = vector.broadcast %cst_40 : f32 to vector<32x64xf32>
    %139 = arith.mulf %138, %137 : vector<32x64xf32>
    %140 = arith.mulf %127, %139 : vector<32x64xf32>
    %141 = arith.truncf %140 : vector<32x64xf32> to vector<32x64xbf16>
    %cst_41 = arith.constant dense<0.000000e+00> : vector<32x32xf32>
    %142 = tpu.matmul %141, %33, %cst_41 {dimension_numbers = #tpu.dot_dimension_numbers<[1], [1], [0], [0], [0, 0, 1, 0], [], []>} : vector<32x64xbf16>, vector<32x64xbf16>, vector<32x32xf32> -> vector<32x32xf32>
    %143 = vector.broadcast %39 : vector<1x32xf32> to vector<32x32xf32>
    %144 = arith.addf %142, %143 : vector<32x32xf32>
    %145 = arith.addf %123, %144 : vector<32x32xf32>
    %cst_42 = arith.constant dense<0.000000e+00> : vector<32xf32>
    %146 = vector.multi_reduction <add>, %145, %cst_42 [1] : vector<32x32xf32> to vector<32xf32>
    %147 = vector.shape_cast %146 : vector<32xf32> to vector<32x1xf32>
    %cst_43 = arith.constant 3.200000e+01 : f32
    %148 = vector.broadcast %cst_43 : f32 to vector<32x1xf32>
    %149 = arith.divf %147, %148 : vector<32x1xf32>
    %150 = vector.broadcast %149 : vector<32x1xf32> to vector<32x32xf32>
    %151 = arith.subf %145, %150 : vector<32x32xf32>
    %152 = arith.mulf %151, %151 : vector<32x32xf32>
    %cst_44 = arith.constant dense<0.000000e+00> : vector<32xf32>
    %153 = vector.multi_reduction <add>, %152, %cst_44 [1] : vector<32x32xf32> to vector<32xf32>
    %154 = vector.shape_cast %153 : vector<32xf32> to vector<32x1xf32>
    %cst_45 = arith.constant 3.200000e+01 : f32
    %155 = vector.broadcast %cst_45 : f32 to vector<32x1xf32>
    %156 = arith.divf %154, %155 : vector<32x1xf32>
    %157 = vector.broadcast %149 : vector<32x1xf32> to vector<32x32xf32>
    %158 = arith.subf %145, %157 : vector<32x32xf32>
    %cst_46 = arith.constant 9.99999996E-13 : f32
    %159 = vector.broadcast %cst_46 : f32 to vector<32x1xf32>
    %160 = arith.addf %156, %159 : vector<32x1xf32>
    %161 = math.rsqrt %160 : vector<32x1xf32>
    %162 = vector.broadcast %161 : vector<32x1xf32> to vector<32x32xf32>
    %163 = arith.mulf %158, %162 : vector<32x32xf32>
    %164 = vector.broadcast %40 : vector<1x32xf32> to vector<32x32xf32>
    %165 = arith.mulf %163, %164 : vector<32x32xf32>
    %166 = vector.broadcast %41 : vector<1x32xf32> to vector<32x32xf32>
    %167 = arith.addf %165, %166 : vector<32x32xf32>
    %c1 = arith.constant 1 : index
    %c0_47 = arith.constant 0 : index
    %c0_48 = arith.constant 0 : index
    %168 = vector.load %arg4[%c1, %c0_47, %c0_48] : memref<2x32x256xbf16, #tpu.memory_space<vmem>>, vector<1x32x256xbf16>
    %169 = vector.shape_cast %168 : vector<1x32x256xbf16> to vector<32x256xbf16>
    %c1_49 = arith.constant 1 : index
    %c0_50 = arith.constant 0 : index
    %c0_51 = arith.constant 0 : index
    %170 = vector.load %arg5[%c1_49, %c0_50, %c0_51] : memref<2x8x96xf32, #tpu.memory_space<vmem>>, vector<1x8x96xf32>
    %171 = vector.shape_cast %170 : vector<1x8x96xf32> to vector<8x96xf32>
    %172 = vector.extract_strided_slice %169 {offsets = [0, 0], sizes = [32, 96], strides = [1, 1]} : vector<32x256xbf16> to vector<32x96xbf16>
    %173 = vector.extract_strided_slice %169 {offsets = [0, 96], sizes = [32, 32], strides = [1, 1]} : vector<32x256xbf16> to vector<32x32xbf16>
    %174 = vector.extract_strided_slice %169 {offsets = [0, 128], sizes = [32, 64], strides = [1, 1]} : vector<32x256xbf16> to vector<32x64xbf16>
    %175 = vector.extract_strided_slice %169 {offsets = [0, 192], sizes = [32, 64], strides = [1, 1]} : vector<32x256xbf16> to vector<32x64xbf16>
    %176 = vector.extract_strided_slice %171 {offsets = [0, 0], sizes = [1, 96], strides = [1, 1]} : vector<8x96xf32> to vector<1x96xf32>
    %177 = vector.extract_strided_slice %171 {offsets = [1, 0], sizes = [1, 32], strides = [1, 1]} : vector<8x96xf32> to vector<1x32xf32>
    %178 = vector.extract_strided_slice %171 {offsets = [2, 0], sizes = [1, 32], strides = [1, 1]} : vector<8x96xf32> to vector<1x32xf32>
    %179 = vector.extract_strided_slice %171 {offsets = [3, 0], sizes = [1, 32], strides = [1, 1]} : vector<8x96xf32> to vector<1x32xf32>
    %180 = vector.extract_strided_slice %171 {offsets = [4, 0], sizes = [1, 64], strides = [1, 1]} : vector<8x96xf32> to vector<1x64xf32>
    %181 = vector.extract_strided_slice %171 {offsets = [5, 0], sizes = [1, 32], strides = [1, 1]} : vector<8x96xf32> to vector<1x32xf32>
    %182 = vector.extract_strided_slice %171 {offsets = [6, 0], sizes = [1, 32], strides = [1, 1]} : vector<8x96xf32> to vector<1x32xf32>
    %183 = vector.extract_strided_slice %171 {offsets = [7, 0], sizes = [1, 32], strides = [1, 1]} : vector<8x96xf32> to vector<1x32xf32>
    %184 = arith.truncf %167 : vector<32x32xf32> to vector<32x32xbf16>
    %cst_52 = arith.constant dense<0.000000e+00> : vector<32x96xf32>
    %185 = tpu.matmul %184, %172, %cst_52 {dimension_numbers = #tpu.dot_dimension_numbers<[1], [0], [0], [1], [0, 0, 1, 1], [], []>} : vector<32x32xbf16>, vector<32x96xbf16>, vector<32x96xf32> -> vector<32x96xf32>
    %186 = vector.broadcast %176 : vector<1x96xf32> to vector<32x96xf32>
    %187 = arith.addf %185, %186 : vector<32x96xf32>
    %cst_53 = arith.constant 0.000000e+00 : f32
    %188 = vector.broadcast %cst_53 : f32 to vector<32x32xf32>
    %189 = vector.extract_strided_slice %187 {offsets = [0, 0], sizes = [32, 16], strides = [1, 1]} : vector<32x96xf32> to vector<32x16xf32>
    %190 = arith.truncf %189 : vector<32x16xf32> to vector<32x16xbf16>
    %191 = vector.extract_strided_slice %187 {offsets = [0, 32], sizes = [32, 16], strides = [1, 1]} : vector<32x96xf32> to vector<32x16xf32>
    %192 = arith.truncf %191 : vector<32x16xf32> to vector<32x16xbf16>
    %193 = vector.extract_strided_slice %187 {offsets = [0, 64], sizes = [32, 16], strides = [1, 1]} : vector<32x96xf32> to vector<32x16xf32>
    %194 = arith.truncf %193 : vector<32x16xf32> to vector<32x16xbf16>
    %cst_54 = arith.constant dense<0.000000e+00> : vector<32x32xf32>
    %195 = tpu.matmul %190, %192, %cst_54 {dimension_numbers = #tpu.dot_dimension_numbers<[1], [1], [0], [0], [0, 0, 1, 0], [], []>} : vector<32x16xbf16>, vector<32x16xbf16>, vector<32x32xf32> -> vector<32x32xf32>
    %cst_55 = arith.constant 2.500000e-01 : f32
    %196 = vector.broadcast %cst_55 : f32 to vector<32x32xf32>
    %197 = arith.mulf %195, %196 : vector<32x32xf32>
    %198 = arith.addf %197, %25 : vector<32x32xf32>
    %cst_56 = arith.constant dense<0xFF800000> : vector<32xf32>
    %199 = vector.multi_reduction <maximumf>, %198, %cst_56 [1] : vector<32x32xf32> to vector<32xf32>
    %200 = vector.shape_cast %199 : vector<32xf32> to vector<32x1xf32>
    %201 = vector.broadcast %200 : vector<32x1xf32> to vector<32x32xf32>
    %202 = arith.subf %198, %201 : vector<32x32xf32>
    %203 = math.exp %202 : vector<32x32xf32>
    %cst_57 = arith.constant dense<0.000000e+00> : vector<32xf32>
    %204 = vector.multi_reduction <add>, %203, %cst_57 [1] : vector<32x32xf32> to vector<32xf32>
    %205 = vector.shape_cast %204 : vector<32xf32> to vector<32x1xf32>
    %206 = tpu.reciprocal %205 {approx = true} : vector<32x1xf32> -> vector<32x1xf32>
    %207 = vector.broadcast %206 : vector<32x1xf32> to vector<32x32xf32>
    %208 = arith.mulf %203, %207 : vector<32x32xf32>
    %209 = arith.truncf %208 : vector<32x32xf32> to vector<32x32xbf16>
    %cst_58 = arith.constant dense<0.000000e+00> : vector<32x16xf32>
    %210 = tpu.matmul %209, %194, %cst_58 {dimension_numbers = #tpu.dot_dimension_numbers<[1], [0], [0], [1], [0, 0, 1, 1], [], []>} : vector<32x32xbf16>, vector<32x16xbf16>, vector<32x16xf32> -> vector<32x16xf32>
    %211 = arith.truncf %210 : vector<32x16xf32> to vector<32x16xbf16>
    %212 = vector.extract_strided_slice %173 {offsets = [0, 0], sizes = [16, 32], strides = [1, 1]} : vector<32x32xbf16> to vector<16x32xbf16>
    %cst_59 = arith.constant dense<0.000000e+00> : vector<32x32xf32>
    %213 = tpu.matmul %211, %212, %cst_59 {dimension_numbers = #tpu.dot_dimension_numbers<[1], [0], [0], [1], [0, 0, 1, 1], [], []>} : vector<32x16xbf16>, vector<16x32xbf16>, vector<32x32xf32> -> vector<32x32xf32>
    %214 = arith.addf %188, %213 : vector<32x32xf32>
    %215 = vector.extract_strided_slice %187 {offsets = [0, 16], sizes = [32, 16], strides = [1, 1]} : vector<32x96xf32> to vector<32x16xf32>
    %216 = arith.truncf %215 : vector<32x16xf32> to vector<32x16xbf16>
    %217 = vector.extract_strided_slice %187 {offsets = [0, 48], sizes = [32, 16], strides = [1, 1]} : vector<32x96xf32> to vector<32x16xf32>
    %218 = arith.truncf %217 : vector<32x16xf32> to vector<32x16xbf16>
    %219 = vector.extract_strided_slice %187 {offsets = [0, 80], sizes = [32, 16], strides = [1, 1]} : vector<32x96xf32> to vector<32x16xf32>
    %220 = arith.truncf %219 : vector<32x16xf32> to vector<32x16xbf16>
    %cst_60 = arith.constant dense<0.000000e+00> : vector<32x32xf32>
    %221 = tpu.matmul %216, %218, %cst_60 {dimension_numbers = #tpu.dot_dimension_numbers<[1], [1], [0], [0], [0, 0, 1, 0], [], []>} : vector<32x16xbf16>, vector<32x16xbf16>, vector<32x32xf32> -> vector<32x32xf32>
    %cst_61 = arith.constant 2.500000e-01 : f32
    %222 = vector.broadcast %cst_61 : f32 to vector<32x32xf32>
    %223 = arith.mulf %221, %222 : vector<32x32xf32>
    %224 = arith.addf %223, %25 : vector<32x32xf32>
    %cst_62 = arith.constant dense<0xFF800000> : vector<32xf32>
    %225 = vector.multi_reduction <maximumf>, %224, %cst_62 [1] : vector<32x32xf32> to vector<32xf32>
    %226 = vector.shape_cast %225 : vector<32xf32> to vector<32x1xf32>
    %227 = vector.broadcast %226 : vector<32x1xf32> to vector<32x32xf32>
    %228 = arith.subf %224, %227 : vector<32x32xf32>
    %229 = math.exp %228 : vector<32x32xf32>
    %cst_63 = arith.constant dense<0.000000e+00> : vector<32xf32>
    %230 = vector.multi_reduction <add>, %229, %cst_63 [1] : vector<32x32xf32> to vector<32xf32>
    %231 = vector.shape_cast %230 : vector<32xf32> to vector<32x1xf32>
    %232 = tpu.reciprocal %231 {approx = true} : vector<32x1xf32> -> vector<32x1xf32>
    %233 = vector.broadcast %232 : vector<32x1xf32> to vector<32x32xf32>
    %234 = arith.mulf %229, %233 : vector<32x32xf32>
    %235 = arith.truncf %234 : vector<32x32xf32> to vector<32x32xbf16>
    %cst_64 = arith.constant dense<0.000000e+00> : vector<32x16xf32>
    %236 = tpu.matmul %235, %220, %cst_64 {dimension_numbers = #tpu.dot_dimension_numbers<[1], [0], [0], [1], [0, 0, 1, 1], [], []>} : vector<32x32xbf16>, vector<32x16xbf16>, vector<32x16xf32> -> vector<32x16xf32>
    %237 = arith.truncf %236 : vector<32x16xf32> to vector<32x16xbf16>
    %238 = vector.extract_strided_slice %173 {offsets = [16, 0], sizes = [16, 32], strides = [1, 1]} : vector<32x32xbf16> to vector<16x32xbf16>
    %cst_65 = arith.constant dense<0.000000e+00> : vector<32x32xf32>
    %239 = tpu.matmul %237, %238, %cst_65 {dimension_numbers = #tpu.dot_dimension_numbers<[1], [0], [0], [1], [0, 0, 1, 1], [], []>} : vector<32x16xbf16>, vector<16x32xbf16>, vector<32x32xf32> -> vector<32x32xf32>
    %240 = arith.addf %214, %239 : vector<32x32xf32>
    %241 = vector.broadcast %177 : vector<1x32xf32> to vector<32x32xf32>
    %242 = arith.addf %240, %241 : vector<32x32xf32>
    %243 = arith.addf %167, %242 : vector<32x32xf32>
    %cst_66 = arith.constant dense<0.000000e+00> : vector<32xf32>
    %244 = vector.multi_reduction <add>, %243, %cst_66 [1] : vector<32x32xf32> to vector<32xf32>
    %245 = vector.shape_cast %244 : vector<32xf32> to vector<32x1xf32>
    %cst_67 = arith.constant 3.200000e+01 : f32
    %246 = vector.broadcast %cst_67 : f32 to vector<32x1xf32>
    %247 = arith.divf %245, %246 : vector<32x1xf32>
    %248 = vector.broadcast %247 : vector<32x1xf32> to vector<32x32xf32>
    %249 = arith.subf %243, %248 : vector<32x32xf32>
    %250 = arith.mulf %249, %249 : vector<32x32xf32>
    %cst_68 = arith.constant dense<0.000000e+00> : vector<32xf32>
    %251 = vector.multi_reduction <add>, %250, %cst_68 [1] : vector<32x32xf32> to vector<32xf32>
    %252 = vector.shape_cast %251 : vector<32xf32> to vector<32x1xf32>
    %cst_69 = arith.constant 3.200000e+01 : f32
    %253 = vector.broadcast %cst_69 : f32 to vector<32x1xf32>
    %254 = arith.divf %252, %253 : vector<32x1xf32>
    %255 = vector.broadcast %247 : vector<32x1xf32> to vector<32x32xf32>
    %256 = arith.subf %243, %255 : vector<32x32xf32>
    %cst_70 = arith.constant 9.99999996E-13 : f32
    %257 = vector.broadcast %cst_70 : f32 to vector<32x1xf32>
    %258 = arith.addf %254, %257 : vector<32x1xf32>
    %259 = math.rsqrt %258 : vector<32x1xf32>
    %260 = vector.broadcast %259 : vector<32x1xf32> to vector<32x32xf32>
    %261 = arith.mulf %256, %260 : vector<32x32xf32>
    %262 = vector.broadcast %178 : vector<1x32xf32> to vector<32x32xf32>
    %263 = arith.mulf %261, %262 : vector<32x32xf32>
    %264 = vector.broadcast %179 : vector<1x32xf32> to vector<32x32xf32>
    %265 = arith.addf %263, %264 : vector<32x32xf32>
    %266 = arith.truncf %265 : vector<32x32xf32> to vector<32x32xbf16>
    %cst_71 = arith.constant dense<0.000000e+00> : vector<32x64xf32>
    %267 = tpu.matmul %266, %174, %cst_71 {dimension_numbers = #tpu.dot_dimension_numbers<[1], [0], [0], [1], [0, 0, 1, 1], [], []>} : vector<32x32xbf16>, vector<32x64xbf16>, vector<32x64xf32> -> vector<32x64xf32>
    %268 = vector.broadcast %180 : vector<1x64xf32> to vector<32x64xf32>
    %269 = arith.addf %267, %268 : vector<32x64xf32>
    %270 = arith.mulf %269, %269 : vector<32x64xf32>
    %271 = arith.mulf %269, %270 : vector<32x64xf32>
    %cst_72 = arith.constant 4.471500e-02 : f32
    %272 = vector.broadcast %cst_72 : f32 to vector<32x64xf32>
    %273 = arith.mulf %272, %271 : vector<32x64xf32>
    %274 = arith.addf %269, %273 : vector<32x64xf32>
    %cst_73 = arith.constant 0.797884583 : f32
    %275 = vector.broadcast %cst_73 : f32 to vector<32x64xf32>
    %276 = arith.mulf %275, %274 : vector<32x64xf32>
    %277 = math.tanh %276 : vector<32x64xf32>
    %cst_74 = arith.constant 1.000000e+00 : f32
    %278 = vector.broadcast %cst_74 : f32 to vector<32x64xf32>
    %279 = arith.addf %278, %277 : vector<32x64xf32>
    %cst_75 = arith.constant 5.000000e-01 : f32
    %280 = vector.broadcast %cst_75 : f32 to vector<32x64xf32>
    %281 = arith.mulf %280, %279 : vector<32x64xf32>
    %282 = arith.mulf %269, %281 : vector<32x64xf32>
    %283 = arith.truncf %282 : vector<32x64xf32> to vector<32x64xbf16>
    %cst_76 = arith.constant dense<0.000000e+00> : vector<32x32xf32>
    %284 = tpu.matmul %283, %175, %cst_76 {dimension_numbers = #tpu.dot_dimension_numbers<[1], [1], [0], [0], [0, 0, 1, 0], [], []>} : vector<32x64xbf16>, vector<32x64xbf16>, vector<32x32xf32> -> vector<32x32xf32>
    %285 = vector.broadcast %181 : vector<1x32xf32> to vector<32x32xf32>
    %286 = arith.addf %284, %285 : vector<32x32xf32>
    %287 = arith.addf %265, %286 : vector<32x32xf32>
    %cst_77 = arith.constant dense<0.000000e+00> : vector<32xf32>
    %288 = vector.multi_reduction <add>, %287, %cst_77 [1] : vector<32x32xf32> to vector<32xf32>
    %289 = vector.shape_cast %288 : vector<32xf32> to vector<32x1xf32>
    %cst_78 = arith.constant 3.200000e+01 : f32
    %290 = vector.broadcast %cst_78 : f32 to vector<32x1xf32>
    %291 = arith.divf %289, %290 : vector<32x1xf32>
    %292 = vector.broadcast %291 : vector<32x1xf32> to vector<32x32xf32>
    %293 = arith.subf %287, %292 : vector<32x32xf32>
    %294 = arith.mulf %293, %293 : vector<32x32xf32>
    %cst_79 = arith.constant dense<0.000000e+00> : vector<32xf32>
    %295 = vector.multi_reduction <add>, %294, %cst_79 [1] : vector<32x32xf32> to vector<32xf32>
    %296 = vector.shape_cast %295 : vector<32xf32> to vector<32x1xf32>
    %cst_80 = arith.constant 3.200000e+01 : f32
    %297 = vector.broadcast %cst_80 : f32 to vector<32x1xf32>
    %298 = arith.divf %296, %297 : vector<32x1xf32>
    %299 = vector.broadcast %291 : vector<32x1xf32> to vector<32x32xf32>
    %300 = arith.subf %287, %299 : vector<32x32xf32>
    %cst_81 = arith.constant 9.99999996E-13 : f32
    %301 = vector.broadcast %cst_81 : f32 to vector<32x1xf32>
    %302 = arith.addf %298, %301 : vector<32x1xf32>
    %303 = math.rsqrt %302 : vector<32x1xf32>
    %304 = vector.broadcast %303 : vector<32x1xf32> to vector<32x32xf32>
    %305 = arith.mulf %300, %304 : vector<32x32xf32>
    %306 = vector.broadcast %182 : vector<1x32xf32> to vector<32x32xf32>
    %307 = arith.mulf %305, %306 : vector<32x32xf32>
    %308 = vector.broadcast %183 : vector<1x32xf32> to vector<32x32xf32>
    %309 = arith.addf %307, %308 : vector<32x32xf32>
    %310 = vector.shape_cast %309 : vector<32x32xf32> to vector<4x8x32xf32>
    %311 = vector.extract_strided_slice %310 {offsets = [0, 0, 0], sizes = [4, 1, 32], strides = [1, 1, 1]} : vector<4x8x32xf32> to vector<4x1x32xf32>
    %312 = vector.shape_cast %311 : vector<4x1x32xf32> to vector<4x32xf32>
    %313 = arith.truncf %312 : vector<4x32xf32> to vector<4x32xbf16>
    %c0_82 = arith.constant 0 : index
    %c0_83 = arith.constant 0 : index
    %314 = vector.load %arg6[%c0_82, %c0_83] : memref<32x32xbf16, #tpu.memory_space<vmem>>, vector<32x32xbf16>
    %cst_84 = arith.constant dense<0.000000e+00> : vector<4x32xf32>
    %315 = tpu.matmul %313, %314, %cst_84 {dimension_numbers = #tpu.dot_dimension_numbers<[1], [0], [0], [1], [0, 0, 1, 1], [], []>} : vector<4x32xbf16>, vector<32x32xbf16>, vector<4x32xf32> -> vector<4x32xf32>
    %c0_85 = arith.constant 0 : index
    %c0_86 = arith.constant 0 : index
    %316 = vector.load %arg7[%c0_85, %c0_86] : memref<1x32xf32, #tpu.memory_space<vmem>>, vector<1x32xf32>
    %317 = vector.broadcast %316 : vector<1x32xf32> to vector<4x32xf32>
    %318 = arith.addf %315, %317 : vector<4x32xf32>
    %319 = math.tanh %318 : vector<4x32xf32>
    %320 = arith.truncf %319 : vector<4x32xf32> to vector<4x32xbf16>
    %c0_87 = arith.constant 0 : index
    %c0_88 = arith.constant 0 : index
    %321 = vector.load %arg8[%c0_87, %c0_88] : memref<32x16xbf16, #tpu.memory_space<vmem>>, vector<32x16xbf16>
    %cst_89 = arith.constant dense<0.000000e+00> : vector<4x16xf32>
    %322 = tpu.matmul %320, %321, %cst_89 {dimension_numbers = #tpu.dot_dimension_numbers<[1], [0], [0], [1], [0, 0, 1, 1], [], []>} : vector<4x32xbf16>, vector<32x16xbf16>, vector<4x16xf32> -> vector<4x16xf32>
    %c0_90 = arith.constant 0 : index
    %c0_91 = arith.constant 0 : index
    %323 = vector.load %arg9[%c0_90, %c0_91] : memref<1x16xf32, #tpu.memory_space<vmem>>, vector<1x16xf32>
    %324 = vector.broadcast %323 : vector<1x16xf32> to vector<4x16xf32>
    %325 = arith.addf %322, %324 : vector<4x16xf32>
    %326 = vector.extract_strided_slice %325 {offsets = [0, 0], sizes = [2, 16], strides = [1, 1]} : vector<4x16xf32> to vector<2x16xf32>
    %327 = vector.extract_strided_slice %325 {offsets = [2, 0], sizes = [2, 16], strides = [1, 1]} : vector<4x16xf32> to vector<2x16xf32>
    %c0_92 = arith.constant 0 : index
    %c0_93 = arith.constant 0 : index
    %328 = vector.load %arg10[%c0_92, %c0_93] : memref<16x256xf32, #tpu.memory_space<vmem>>, vector<16x256xf32>
    %cst_94 = arith.constant dense<0.000000e+00> : vector<2x256xf32>
    %329 = tpu.matmul %326, %328, %cst_94 {dimension_numbers = #tpu.dot_dimension_numbers<[1], [0], [0], [1], [0, 0, 1, 1], [], []>} : vector<2x16xf32>, vector<16x256xf32>, vector<2x256xf32> -> vector<2x256xf32>
    %c0_95 = arith.constant 0 : index
    %c0_96 = arith.constant 0 : index
    %330 = vector.load %arg11[%c0_95, %c0_96] : memref<16x256xf32, #tpu.memory_space<vmem>>, vector<16x256xf32>
    %cst_97 = arith.constant dense<0.000000e+00> : vector<2x256xf32>
    %331 = tpu.matmul %327, %330, %cst_97 {dimension_numbers = #tpu.dot_dimension_numbers<[1], [0], [0], [1], [0, 0, 1, 1], [], []>} : vector<2x16xf32>, vector<16x256xf32>, vector<2x256xf32> -> vector<2x256xf32>
    %332 = arith.mulf %329, %331 : vector<2x256xf32>
    %c0_98 = arith.constant 0 : index
    %c0_99 = arith.constant 0 : index
    %333 = vector.load %arg12[%c0_98, %c0_99] : memref<256x128xf32, #tpu.memory_space<vmem>>, vector<256x128xf32>
    %cst_100 = arith.constant dense<0.000000e+00> : vector<2x128xf32>
    %334 = tpu.matmul %332, %333, %cst_100 {dimension_numbers = #tpu.dot_dimension_numbers<[1], [0], [0], [1], [0, 0, 1, 1], [], []>} : vector<2x256xf32>, vector<256x128xf32>, vector<2x128xf32> -> vector<2x128xf32>
    %c0_101 = arith.constant 0 : index
    %c0_102 = arith.constant 0 : index
    %335 = vector.load %arg13[%c0_101, %c0_102] : memref<1x128xf32, #tpu.memory_space<vmem>>, vector<1x128xf32>
    %336 = vector.broadcast %335 : vector<1x128xf32> to vector<2x128xf32>
    %337 = arith.addf %334, %336 : vector<2x128xf32>
    %cst_103 = arith.constant dense<0xFF800000> : vector<2xf32>
    %338 = vector.multi_reduction <maximumf>, %337, %cst_103 [1] : vector<2x128xf32> to vector<2xf32>
    %339 = vector.shape_cast %338 : vector<2xf32> to vector<2x1xf32>
    %340 = vector.broadcast %339 : vector<2x1xf32> to vector<2x128xf32>
    %341 = arith.subf %337, %340 : vector<2x128xf32>
    %342 = math.exp %341 : vector<2x128xf32>
    %cst_104 = arith.constant dense<0.000000e+00> : vector<2xf32>
    %343 = vector.multi_reduction <add>, %342, %cst_104 [1] : vector<2x128xf32> to vector<2xf32>
    %344 = vector.shape_cast %343 : vector<2xf32> to vector<2x1xf32>
    %345 = math.log %344 : vector<2x1xf32>
    %346 = arith.addf %339, %345 : vector<2x1xf32>
    %347 = vector.broadcast %346 : vector<2x1xf32> to vector<2x128xf32>
    %348 = arith.subf %337, %347 : vector<2x128xf32>
    %c0_105 = arith.constant 0 : index
    %c0_106 = arith.constant 0 : index
    %349 = vector.load %arg14[%c0_105, %c0_106] : memref<2x128xf32, #tpu.memory_space<vmem>>, vector<2x128xf32>
    tpu.vector_store %arg14[%c0_105, %c0_106], %348 {strides = array<i32>} : memref<2x128xf32, #tpu.memory_space<vmem>>, vector<2x128xf32>,
    return
  }
}

</mosaic_0001>

<bundles_post_ra>
// kernel: bert_nli_forward.1
= control target key start
LH: loop header
LB: loop body
LE: loop exit
PB: predicated region body
PF: predicated region fallthrough
CT: control target
= control target key end

     0   :  { %vm54_vm0 = vcmask 261120   ;;  %v139_v62 = vlaneseq  ;;  %vm218_vm1 = vcmask 130048   ;;  %s2855_s28 = smov 96   ;;  %s2856_s29 = smov 112   ;;  %vm894_vm2 = vcmask 523264   ;;  %s3551_s0 = inlined_call_operand.vmem [shape: f32[32,32], index: 0, kind: input, shape index: {}]   ;;  %s3552_s4 = inlined_call_operand.vmem [shape: bf16[2,32,256], index: 4, kind: input, shape index: {}]   ;;  %s3553_s2 = inlined_call_operand.vmem [shape: f32[1,32], index: 2, kind: input, shape index: {}]   ;;  %s3554_s3 = inlined_call_operand.vmem [shape: f32[1,32], index: 3, kind: input, shape index: {}]   ;;  %s3555_s5 = inlined_call_operand.vmem [shape: f32[2,8,96], index: 5, kind: input, shape index: {}]   ;;  %s3556_s1 = inlined_call_operand.vmem [shape: f32[32,32], index: 1, kind: input, shape index: {}]   ;;  %s3557_s6 = inlined_call_operand.vmem [shape: bf16[32,32], index: 6, kind: input, shape index: {}]   ;;  %s3558_s8 = inlined_call_operand.vmem [shape: bf16[32,16], index: 8, kind: input, shape index: {}]   ;;  %s3559_s10 = inlined_call_operand.vmem [shape: f32[16,256], index: 10, kind: input, shape index: {}]   ;;  %s3560_s11 = inlined_call_operand.vmem [shape: f32[16,256], index: 11, kind: input, shape index: {}]   ;;  %s3561_s7 = inlined_call_operand.vmem [shape: f32[1,32], index: 7, kind: input, shape index: {}]   ;;  %s3562_s12 = inlined_call_operand.vmem [shape: f32[256,128], index: 12, kind: input, shape index: {}]   ;;  %s3563_s9 = inlined_call_operand.vmem [shape: f32[1,16], index: 9, kind: input, shape index: {}]   ;;  %s3564_s13 = inlined_call_operand.vmem [shape: f32[1,128], index: 13, kind: input, shape index: {}]   ;;  %s3565_s14 = inlined_call_operand.vmem [shape: f32[2,128], index: 14, kind: output, shape index: {}]  }
   0x1   :  { %v48_v0 = vld [vmem:[%s3551_s0] sm:$0xff]  ;;  %v50_v1 = vld [vmem:[%s3551_s0 + $0x10] sm:$0xff]  ;;  %v49_v2 = vld [vmem:[%s3551_s0 + $0x8] sm:$0xff]  ;;  %s2857_s30 = smov 80   ;;  %s2858_s22 = smov 48   ;;  %vm2862_vm3 = vmmov 0  }
   0x2   :  { %v55_v3 = vsel %vm54_vm0, %v48_v0, 0.0  ;;  %v61_v4 = vsel %vm54_vm0, %v50_v1, 0.0  ;;  %v51_v5 = vld [vmem:[%s3551_s0 + $0x18] sm:$0xff]  ;;  %v58_v6 = vsel %vm54_vm0, %v49_v2, 0.0  ;;  %v2966_v29 = vld [vmem:[%s3552_s4] ss:$8 sps:$4 sm:$0xff]  }
   0x3   :  { %56 = vadd.xlane.f32.xlu0 %v55_v3  ;;  %62 = vadd.xlane.f32.xlu1 %v61_v4  ;;  %v64_v7 = vsel %vm54_vm0, %v51_v5, 0.0  ;;  %v2961_v28 = vld [vmem:[%s3552_s4 + $0x10] ss:$8 sps:$4 sm:$0xff]   ;;  %v2366_v44 = vld [vmem:[%s3553_s2] ss:$0 sm:$0xff]  ;;  %v2992_v63 = vshrl.u32 %v139_v62, 7 }
   0x4   :  { %2537 = vmatprep.subr.bf16.mxu0 %v2961_v28  ;;  %v2367_v49 = vld [vmem:[%s3554_s3] ss:$0 sm:$0xff]  ;;  %s2859_s23 = smov 64   ;;  %s2860_s24 = smov 32   ;;  %vm1948_vm4 = vcmask 1041409   ;;  %vm1951_vm5 = vcmask 1042434  }
   0x5   :  { %2538 = vmatpush3.bf16.msra.mxu0 %v2961_v28  ;;  %vm1954_vm6 = vcmask 1043459   ;;  %vm2347_vm7 = vcmask 1041408  }
   0x6   :  { %2539 = vmatprep.subr.bf16.mxu0 %v2966_v29 }
   0x7   :  { %59 = vadd.xlane.f32.xlu0 %v58_v6  ;;  %65 = vadd.xlane.f32.xlu1 %v64_v7 }
   0x9   :  { %2540 = vmatpush3.bf16.msra.mxu0 %v2966_v29 }
  0x8c   :  { %v57_v8 = vpop.xlane.xlu0 %56  ;;  %v63_v9 = vpop.xlane.xlu1 %62 }
  0x8d   :  { %v68_v10 = vmul.f32 0.03125, %v57_v8  ;;  %v70_v11 = vmul.f32 0.03125, %v63_v9 }
  0x8f   :  { %v72_v12 = vsub.f32 %v48_v0, %v68_v10  ;;  %v74_v13 = vsub.f32 %v50_v1, %v70_v11  ;;  %v141_v0 = vsub.s32 0, %v2992_v63  ;;  %v2998_v1 = vld [vmem:[%s3555_s5] sm:$0xff] }
  0x90   :  { %v60_v14 = vpop.xlane.xlu0 %59  ;;  %v66_v15 = vpop.xlane.xlu1 %65 }
  0x91   :  { %v69_v16 = vmul.f32 0.03125, %v60_v14  ;;  %v71_v17 = vmul.f32 0.03125, %v66_v15  ;;  %v76_v18 = vmul.f32 %v72_v12, %v72_v12  ;;  %v78_v19 = vmul.f32 %v74_v13, %v74_v13 }
  0x92   :  { %v142_v3 = vrot.slane %v2998_v1, %v141_v0 }
  0x93   :  { %v73_v20 = vsub.f32 %v49_v2, %v69_v16  ;;  %v75_v21 = vsub.f32 %v51_v5, %v71_v17  ;;  %v80_v22 = vsel %vm54_vm0, %v76_v18, 0.0  ;;  %v86_v23 = vsel %vm54_vm0, %v78_v19, 0.0 }
  0x94   :  { %81 = vadd.xlane.f32.xlu0 %v80_v22 }
  0x95   :  { %v77_v24 = vmul.f32 %v73_v20, %v73_v20  ;;  %v79_v25 = vmul.f32 %v75_v21, %v75_v21 }
  0x97   :  { %v83_v26 = vsel %vm54_vm0, %v77_v24, 0.0  ;;  %v89_v27 = vsel %vm54_vm0, %v79_v25, 0.0  ;;  %v3036_v24 = vld [vmem:[%s3556_s1 + $0x10] sm:$0xff] }
  0x98   :  { %87 = vadd.xlane.f32.xlu0 %v86_v23  ;;  %84 = vadd.xlane.f32.xlu1 %v83_v26 }
  0x9c   :  { %90 = vadd.xlane.f32.xlu1 %v89_v27  ;;  %v3041_v27 = vld [vmem:[%s3556_s1] sm:$0xff] }
 0x11d   :  { %v82_v30 = vpop.xlane.xlu0 %81 }
 0x11e   :  { %v92_v31 = vmul.f32 0.03125, %v82_v30 }
 0x120   :  { %v96_v32 = vadd.f32 1e-12, %v92_v31 }
 0x121   :  { %v85_v33 = vpop.xlane.xlu1 %84  ;;  %v88_v34 = vpop.xlane.xlu0 %87 }
 0x122   :  { %2725 = vrsqrt.f32 %v96_v32  ;;  %v93_v35 = vmul.f32 0.03125, %v85_v33  ;;  %v94_v36 = vmul.f32 0.03125, %v88_v34  ;;  %v3047_v33 = vld [vmem:[%s3556_s1 + $0x18] sm:$0xff] }
 0x124   :  { %v97_v37 = vadd.f32 1e-12, %v93_v35  ;;  %v98_v38 = vadd.f32 1e-12, %v94_v36 }
 0x125   :  { %v91_v39 = vpop.xlane.xlu1 %90 }
 0x126   :  { %2727 = vrsqrt.f32 %v97_v37  ;;  %v95_v40 = vmul.f32 0.03125, %v91_v39 }
 0x127   :  { %2729 = vrsqrt.f32 %v98_v38  ;;  %v3054_v38 = vld [vmem:[%s3556_s1 + $0x8] sm:$0xff] }
 0x128   :  { %v99_v41 = vadd.f32 1e-12, %v95_v40 }
 0x12a   :  { %2731 = vrsqrt.f32 %v99_v41 }
 0x12f   :  { %v2726_v42 = vpop.eup %2725 }
 0x130   :  { %v104_v43 = vmul.f32 %v2726_v42, %v72_v12 }
 0x132   :  { %v114_v48 = vmul.f32 %v2366_v44, %v104_v43 }
 0x133   :  { %v2728_v45 = vpop.eup %2727 }
 0x134   :  { %v2730_v46 = vpop.eup %2729  ;;  %v105_v47 = vmul.f32 %v2728_v45, %v73_v20  ;;  %v2978_v53 = vadd.f32 %v2367_v49, %v114_v48 }
 0x135   :  { %v106_v50 = vmul.f32 %v2730_v46, %v74_v13 }
 0x136   :  { %v115_v51 = vmul.f32 %v2366_v44, %v105_v47 }
 0x137   :  { %v2732_v52 = vpop.eup %2731  ;;  %v116_v56 = vmul.f32 %v2366_v44, %v106_v50 }
 0x138   :  { %v2980_v54 = vadd.f32 %v2367_v49, %v115_v51  ;;  %v107_v55 = vmul.f32 %v2732_v52, %v75_v21 }
 0x139   :  { %v2985_v59 = vadd.f32 %v2367_v49, %v116_v56 }
 0x13a   :  { %v137_v57 = vpack.c.bf16 %v2980_v54, %v2978_v53  ;;  %v117_v58 = vmul.f32 %v2366_v44, %v107_v55 }
 0x13c   :  { %2541 = vmatprep.mubr.msk.bf16.mxu0 %vm54_vm0, %v137_v57  ;;  %v2987_v60 = vadd.f32 %v2367_v49, %v117_v58 }
 0x13e   :  { %v138_v61 = vpack.c.bf16 %v2987_v60, %v2985_v59 }
 0x140   :  { %2542 = vmatmul.mubr.msk.bf16.vlgmr.msra.gmra.mxu0 %vm54_vm0, %v138_v61 }
 0x200   :  { %v2543_v2 = vpop.f32.mrf.mxu0 }
 0x201   :  { %v204_v6 = vadd.f32 %v2543_v2, %v142_v3 }
 0x202   :  { %v195_v4 = vpop.f32.mrf.mxu0 }
 0x203   :  { %v196_v9 = vadd.f32 %v195_v4, %v142_v3 }
 0x204   :  { %v2544_v5 = vpop.f32.mrf.mxu0 }
 0x205   :  { %v207_v7 = vadd.f32 %v2544_v5, %v142_v3 }
 0x206   :  { %v198_v8 = vpop.f32.mrf.mxu0 }
 0x207   :  { %v3003_v10 = vpack.c.bf16 %v207_v7, %v204_v6  ;;  %v199_v11 = vadd.f32 %v198_v8, %v142_v3 }
 0x209   :  { %v3005_v12 = vpack.c.bf16 %v199_v11, %v196_v9  ;;  %216 = vrot.lane.b32.xlu0 %v3003_v10, %s2855_s28 }
 0x20b   :  { %214 = vrot.lane.b32.xlu1 %v3005_v12, %s2855_s28  ;;  %2549 = vmatprep.mubr.msk.bf16.mxu1 %vm218_vm1, %v3005_v12 }
 0x20d   :  { %397 = vrot.lane.b32.xlu0 %v3005_v12, %s2856_s29 }
 0x20f   :  { %403 = vrot.lane.b32.xlu1 %v3003_v10, %s2857_s30 }
 0x213   :  { %401 = vrot.lane.b32.xlu1 %v3005_v12, %s2857_s30 }
 0x217   :  { %399 = vrot.lane.b32.xlu1 %v3003_v10, %s2856_s29 }
 0x27b   :  { %v217_v13 = vpop.permute.xlu0 %216 }
 0x27c   :  { %2689 = vmatprep.subr.msk.bf16.mxu1 %vm218_vm1, %v217_v13  ;;  %v229_v14 = vsel %vm218_vm1, %v217_v13, 0 }
 0x27d   :  { %2546 = vmatpush3.bf16.xpose.msra.mxu1 %v229_v14  ;;  %v215_v15 = vpop.permute.xlu1 %214 }
 0x27e   :  { %2690 = vmatprep.subr.msk.bf16.mxu1 %vm218_vm1, %v215_v15  ;;  %v226_v16 = vsel %vm218_vm1, %v215_v15, 0 }
 0x27f   :  { %v398_v18 = vpop.permute.xlu0 %397 }
 0x281   :  { %v404_v17 = vpop.permute.xlu1 %403 }
 0x282   :  { %v415_v19 = vsel %vm218_vm1, %v404_v17, 0 }
 0x285   :  { %2548 = vmatpush3.bf16.xpose.msra.mxu1 %v226_v16  ;;  %v402_v20 = vpop.permute.xlu1 %401 }
 0x286   :  { %2691 = vmatprep.subr.msk.bf16.mxu1 %vm218_vm1, %v404_v17  ;;  %v412_v21 = vsel %vm218_vm1, %v402_v20, 0 }
 0x289   :  { %v400_v22 = vpop.permute.xlu1 %399 }
 0x28c   :  { %2550 = vmatmul.mubr.msk.bf16.vlgmr.msra.gmra.mxu1 %vm218_vm1, %v3003_v10 }
 0x28d   :  { %2562 = vmatpush3.bf16.xpose.msra.mxu1 %v415_v19  ;;  %2565 = vmatprep.mubr.msk.bf16.mxu1 %vm218_vm1, %v398_v18 }
 0x28e   :  { %2692 = vmatprep.subr.msk.bf16.mxu1 %vm218_vm1, %v402_v20 }
 0x295   :  { %2564 = vmatpush3.bf16.xpose.msra.mxu1 %v412_v21 }
 0x29c   :  { %2566 = vmatmul.mubr.msk.bf16.vlgmr.msra.gmra.mxu1 %vm218_vm1, %v400_v22 }
 0x34c   :  { %v2551_v23 = vpop.f32.mrf.mxu1 }
 0x34d   :  { %v282_v25 = vmul.f32 0.25, %v2551_v23 }
 0x34e   :  { %v265_v26 = vpop.f32.mrf.mxu1 }
 0x34f   :  { %v280_v30 = vmul.f32 0.25, %v265_v26  ;;  %v286_v31 = vadd.f32 %v282_v25, %v3036_v24 }
 0x350   :  { %v2552_v32 = vpop.f32.mrf.mxu1 }
 0x351   :  { %v283_v34 = vmul.f32 0.25, %v2552_v32  ;;  %v294_v35 = vsel %vm54_vm0, %v286_v31, -inf  ;;  %v284_v36 = vadd.f32 %v280_v30, %v3041_v27 }
 0x352   :  { %295 = vmax.xlane.f32.xlu0 %v294_v35  ;;  %v268_v37 = vpop.f32.mrf.mxu1 }
 0x353   :  { %v281_v39 = vmul.f32 0.25, %v268_v37  ;;  %v287_v40 = vadd.f32 %v283_v34, %v3047_v33  ;;  %v288_v41 = vsel %vm54_vm0, %v284_v36, -inf }
 0x355   :  { %v297_v42 = vsel %vm54_vm0, %v287_v40, -inf  ;;  %v285_v43 = vadd.f32 %v281_v39, %v3054_v38 }
 0x356   :  { %289 = vmax.xlane.f32.xlu0 %v288_v41  ;;  %298 = vmax.xlane.f32.xlu1 %v297_v42 }
 0x357   :  { %v291_v44 = vsel %vm54_vm0, %v285_v43, -inf }
 0x35a   :  { %292 = vmax.xlane.f32.xlu1 %v291_v44 }
 0x35c   :  { %v2567_v45 = vpop.f32.mrf.mxu1 }
 0x35d   :  { %v468_v52 = vmul.f32 0.25, %v2567_v45 }
 0x35e   :  { %v451_v46 = vpop.f32.mrf.mxu1 }
 0x35f   :  { %v466_v47 = vmul.f32 0.25, %v451_v46  ;;  %v472_v2 = vadd.f32 %v468_v52, %v3036_v24 }
 0x360   :  { %v2568_v48 = vpop.f32.mrf.mxu1 }
 0x361   :  { %v469_v49 = vmul.f32 0.25, %v2568_v48  ;;  %v470_v50 = vadd.f32 %v466_v47, %v3041_v27  ;;  %v480_v3 = vsel %vm54_vm0, %v472_v2, -inf }
 0x362   :  { %v454_v51 = vpop.f32.mrf.mxu1 }
 0x363   :  { %v467_v55 = vmul.f32 0.25, %v454_v51  ;;  %v474_v56 = vsel %vm54_vm0, %v470_v50, -inf  ;;  %v473_v57 = vadd.f32 %v469_v49, %v3047_v33 }
 0x364   :  { %475 = vmax.xlane.f32.xlu0 %v474_v56 }
 0x365   :  { %v483_v58 = vsel %vm54_vm0, %v473_v57, -inf  ;;  %v471_v61 = vadd.f32 %v467_v55, %v3054_v38 }
 0x366   :  { %484 = vmax.xlane.f32.xlu1 %v483_v58 }
 0x367   :  { %v477_v62 = vsel %vm54_vm0, %v471_v61, -inf }
 0x368   :  { %478 = vmax.xlane.f32.xlu0 %v477_v62 }
 0x36c   :  { %481 = vmax.xlane.f32.xlu0 %v480_v3 }
 0x3db   :  { %v296_v4 = vpop.xlane.xlu0 %295 }
 0x3dc   :  { %v302_v5 = vsub.f32 %v286_v31, %v296_v4 }
 0x3de   :  { %v308_v6 = vmul.f32 1.442695, %v302_v5 }
 0x3df   :  { %v290_v7 = vpop.xlane.xlu0 %289  ;;  %v299_v8 = vpop.xlane.xlu1 %298 }
 0x3e0   :  { %2733 = vpow2.f32 %v308_v6  ;;  %v300_v9 = vsub.f32 %v284_v36, %v290_v7  ;;  %v303_v11 = vsub.f32 %v287_v40, %v299_v8 }
 0x3e2   :  { %v304_v13 = vmul.f32 1.442695, %v300_v9  ;;  %v310_v14 = vmul.f32 1.442695, %v303_v11 }
 0x3e3   :  { %v293_v15 = vpop.xlane.xlu1 %292 }
 0x3e4   :  { %2735 = vpow2.f32 %v304_v13  ;;  %v301_v16 = vsub.f32 %v285_v43, %v293_v15 }
 0x3e5   :  { %2737 = vpow2.f32 %v310_v14 }
 0x3e6   :  { %v306_v17 = vmul.f32 1.442695, %v301_v16 }
 0x3e8   :  { %2739 = vpow2.f32 %v306_v17 }
 0x3ed   :  { %v3069_v18 = vpop.eup %2733  ;;  %v476_v19 = vpop.xlane.xlu0 %475 }
 0x3ee   :  { %v318_v20 = vsel %vm54_vm0, %v3069_v18, 0.0  ;;  %v486_v30 = vsub.f32 %v470_v50, %v476_v19 }
 0x3ef   :  { %319 = vadd.xlane.f32.xlu0 %v318_v20  ;;  %v485_v43 = vpop.xlane.xlu1 %484 }
 0x3f0   :  { %v490_v36 = vmul.f32 1.442695, %v486_v30  ;;  %v489_v44 = vsub.f32 %v473_v57, %v485_v43 }
 0x3f1   :  { %v2736_v21 = vpop.eup %2735  ;;  %v479_v22 = vpop.xlane.xlu0 %478 }
 0x3f2   :  { %v3073_v23 = vpop.eup %2737  ;;  %v312_v25 = vsel %vm54_vm0, %v2736_v21, 0.0  ;;  %v496_v45 = vmul.f32 1.442695, %v489_v44  ;;  %v487_v46 = vsub.f32 %v471_v61, %v479_v22 }
 0x3f3   :  { %313 = vadd.xlane.f32.xlu0 %v312_v25  ;;  %v321_v26 = vsel %vm54_vm0, %v3073_v23, 0.0 }
 0x3f4   :  { %322 = vadd.xlane.f32.xlu1 %v321_v26  ;;  %v492_v47 = vmul.f32 1.442695, %v487_v46  ;;  %v701_v46 = vsub.s32 1, %v2992_v63 }
 0x3f5   :  { %v2740_v31 = vpop.eup %2739  ;;  %v482_v32 = vpop.xlane.xlu0 %481 }
 0x3f6   :  { %v488_v34 = vsub.f32 %v472_v2, %v482_v32  ;;  %v315_v35 = vsel %vm54_vm0, %v2740_v31, 0.0 }
 0x3f8   :  { %v494_v37 = vmul.f32 1.442695, %v488_v34  ;;  %316 = vadd.xlane.f32.xlu1 %v315_v35 }
 0x3fa   :  { %2741 = vpow2.f32 %v494_v37 }
 0x3fb   :  { %2743 = vpow2.f32 %v490_v36 }
 0x3fc   :  { %2745 = vpow2.f32 %v496_v45 }
 0x3fd   :  { %2747 = vpow2.f32 %v492_v47 }
 0x407   :  { %v3079_v39 = vpop.eup %2741 }
 0x408   :  { %v504_v40 = vsel %vm54_vm0, %v3079_v39, 0.0  ;;  %v3083_v41 = vpop.eup %2743 }
 0x409   :  { %522 = vrot.lane.b32.xlu1 %v3003_v10, %s2858_s22  ;;  %505 = vadd.xlane.f32.xlu0 %v504_v40  ;;  %v498_v42 = vsel %vm54_vm0, %v3083_v41, 0.0  ;;  %v2746_v48 = vpop.eup %2745 }
 0x40a   :  { %v507_v49 = vsel %vm54_vm0, %v2746_v48, 0.0  ;;  %v2748_v50 = vpop.eup %2747 }
 0x40b   :  { %v501_v51 = vsel %vm54_vm0, %v2748_v50, 0.0 }
 0x40d   :  { %334 = vrot.lane.b32.xlu1 %v3005_v12, %s2859_s23  ;;  %499 = vadd.xlane.f32.xlu0 %v498_v42 }
 0x423   :  { %336 = vrot.lane.b32.xlu0 %v3003_v10, %s2859_s23 }
 0x427   :  { %583 = vrot.lane.b32.xlu0 %v2961_v28, %s2860_s24 }
 0x431   :  { %508 = vadd.xlane.f32.xlu1 %v507_v49 }
 0x435   :  { %502 = vadd.xlane.f32.xlu1 %v501_v51 }
 0x446   :  { %520 = vrot.lane.b32.xlu1 %v3005_v12, %s2858_s22 }
 0x44a   :  { %641 = vrot.lane.b32.xlu1 %v2966_v29, %s2860_s24 }
 0x478   :  { %v320_v10 = vpop.xlane.xlu0 %319 }
 0x47c   :  { %v314_v52 = vpop.xlane.xlu0 %313 }
 0x47d   :  { %v323_v55 = vpop.xlane.xlu1 %322  ;;  %2749 = vrcp.f32 %v314_v52 }
 0x481   :  { %v317_v56 = vpop.xlane.xlu1 %316 }
 0x482   :  { %2751 = vrcp.f32 %v317_v56 }
 0x483   :  { %2753 = vrcp.f32 %v323_v55 }
 0x484   :  { %2755 = vrcp.f32 %v320_v10 }
 0x485   :  { %v523_v57 = vpop.permute.xlu1 %522 }
 0x486   :  { %2569 = vmatprep.subr.bf16.mxu1 %v523_v57 }
 0x487   :  { %2570 = vmatpush3.bf16.msra.mxu1 %v523_v57 }
 0x489   :  { %v335_v6 = vpop.permute.xlu1 %334 }
 0x48a   :  { %v2750_v58 = vpop.eup %2749 }
 0x48b   :  { %v328_v12 = vmul.f32 %v2750_v58, %v2736_v21 }
 0x48f   :  { %v2752_v61 = vpop.eup %2751 }
 0x490   :  { %v329_v62 = vmul.f32 %v2752_v61, %v2740_v31  ;;  %v2754_v3 = vpop.eup %2753 }
 0x491   :  { %v2756_v5 = vpop.eup %2755  ;;  %v331_v7 = vmul.f32 %v2754_v3, %v3073_v23 }
 0x492   :  { %v506_v2 = vpop.xlane.xlu0 %505  ;;  %v332_v29 = vpack.c.bf16 %v329_v62, %v328_v12  ;;  %v330_v8 = vmul.f32 %v2756_v5, %v3069_v18 }
 0x494   :  { %2557 = vmatprep.mubr.msk.bf16.mxu0 %vm54_vm0, %v332_v29  ;;  %v333_v9 = vpack.c.bf16 %v331_v7, %v330_v8 }
 0x496   :  { %v500_v28 = vpop.xlane.xlu0 %499 }
 0x49a   :  { %v337_v4 = vpop.permute.xlu0 %336 }
 0x49b   :  { %2553 = vmatprep.subr.bf16.mxu0 %v337_v4 }
 0x49c   :  { %2554 = vmatpush3.bf16.msra.mxu0 %v337_v4 }
 0x49d   :  { %2555 = vmatprep.subr.bf16.mxu0 %v335_v6 }
 0x49e   :  { %v584_v30 = vpop.permute.xlu0 %583 }
 0x4a0   :  { %2556 = vmatpush3.bf16.msra.mxu0 %v335_v6 }
 0x4a3   :  { %2558 = vmatmul.mubr.msk.bf16.vlgmr.msra.gmra.mxu0 %vm54_vm0, %v333_v9 }
 0x4ba   :  { %v509_v11 = vpop.xlane.xlu1 %508 }
 0x4bb   :  { %2757 = vrcp.f32 %v509_v11 }
 0x4bc   :  { %2759 = vrcp.f32 %v500_v28 }
 0x4bd   :  { %2761 = vrcp.f32 %v506_v2 }
 0x4be   :  { %v503_v13 = vpop.xlane.xlu1 %502 }
 0x4bf   :  { %2763 = vrcp.f32 %v503_v13 }
 0x4c2   :  { %v521_v14 = vpop.permute.xlu1 %520 }
 0x4c3   :  { %2571 = vmatprep.subr.bf16.mxu1 %v521_v14 }
 0x4c4   :  { %2572 = vmatpush3.bf16.msra.mxu1 %v521_v14 }
 0x4c5   :  { %2577 = vmatprep.subr.bf16.mxu1 %v584_v30 }
 0x4c6   :  { %v642_v26 = vpop.permute.xlu1 %641 }
 0x4c7   :  { %2583 = vmatprep.subr.bf16.mxu0 %v642_v26 }
 0x4c8   :  { %v2758_v15 = vpop.eup %2757  ;;  %2584 = vmatpush3.bf16.msra.mxu0 %v642_v26 }
 0x4c9   :  { %v2760_v16 = vpop.eup %2759  ;;  %v517_v20 = vmul.f32 %v2758_v15, %v2746_v48 }
 0x4ca   :  { %v2762_v17 = vpop.eup %2761  ;;  %v514_v18 = vmul.f32 %v2760_v16, %v3083_v41 }
 0x4cb   :  { %v516_v22 = vmul.f32 %v2762_v17, %v3079_v39 }
 0x4cc   :  { %v2764_v19 = vpop.eup %2763 }
 0x4cd   :  { %v515_v21 = vmul.f32 %v2764_v19, %v2748_v50  ;;  %v519_v25 = vpack.c.bf16 %v517_v20, %v516_v22  ;;  %v702_v50 = vrot.slane %v2998_v1, %v701_v46 }
 0x4cf   :  { %v518_v23 = vpack.c.bf16 %v515_v21, %v514_v18 }
 0x4d1   :  { %2573 = vmatprep.mubr.msk.bf16.mxu1 %vm54_vm0, %v518_v23 }
 0x4d2   :  { %2574 = vmatmul.mubr.msk.bf16.vlgmr.msra.gmra.mxu1 %vm54_vm0, %v519_v25 }
 0x4d3   :  { %2578 = vmatpush3.bf16.msra.mxu1 %v584_v30 }
 0x563   :  { %v2559_v31 = vpop.f32.mrf.mxu0 }
 0x565   :  { %v380_v32 = vpop.f32.mrf.mxu0 }
 0x567   :  { %v2560_v34 = vpop.f32.mrf.mxu0 }
 0x568   :  { %v396_v37 = vpack.c.bf16 %v2560_v34, %v2559_v31  ;;  %v2714_v34 = vld [vmem:[%s3552_s4 + $0x4] ss:$8 sps:$4 sm:$0xff]  }
 0x569   :  { %v383_v35 = vpop.f32.mrf.mxu0 }
 0x56a   :  { %v395_v36 = vpack.c.bf16 %v383_v35, %v380_v32  ;;  %v2713_v32 = vld [vmem:[%s3552_s4 + $0x14] ss:$8 sps:$4 sm:$0xff]  }
 0x56b   :  { %2589 = vmatprep.subr.bf16.mxu1 %v2713_v32 }
 0x56c   :  { %2585 = vmatprep.mubr.msk.bf16.mxu0 %vm218_vm1, %v395_v36 }
 0x56d   :  { %2586 = vmatmul.mubr.msk.bf16.vlgmr.msra.gmra.mxu0 %vm218_vm1, %v396_v37 }
 0x592   :  { %v2575_v39 = vpop.f32.mrf.mxu1 }
 0x594   :  { %v566_v40 = vpop.f32.mrf.mxu1 }
 0x596   :  { %v2576_v41 = vpop.f32.mrf.mxu1 }
 0x597   :  { %v582_v44 = vpack.c.bf16 %v2576_v41, %v2575_v39 }
 0x598   :  { %v569_v42 = vpop.f32.mrf.mxu1 }
 0x599   :  { %v581_v43 = vpack.c.bf16 %v569_v42, %v566_v40 }
 0x59b   :  { %2579 = vmatprep.mubr.msk.bf16.mxu1 %vm218_vm1, %v581_v43 }
 0x59c   :  { %2580 = vmatmul.mubr.msk.bf16.vlgmr.msra.gmra.mxu1 %vm218_vm1, %v582_v44 }
 0x59d   :  { %2590 = vmatpush3.bf16.msra.mxu1 %v2713_v32 }
 0x59e   :  { %2591 = vmatprep.subr.bf16.mxu1 %v2714_v34 }
 0x5a1   :  { %2592 = vmatpush3.bf16.msra.mxu1 %v2714_v34 }
 0x62d   :  { %v2587_v45 = vpop.f32.mrf.mxu0 }
 0x62f   :  { %v684_v47 = vpop.f32.mrf.mxu0 }
 0x631   :  { %v2588_v51 = vpop.f32.mrf.mxu0 }
 0x633   :  { %v687_v61 = vpop.f32.mrf.mxu0 }
 0x65c   :  { %v2581_v48 = vpop.f32.mrf.mxu1 }
 0x65d   :  { %v693_v49 = vadd.f32 %v2587_v45, %v2581_v48 }
 0x65e   :  { %v626_v10 = vpop.f32.mrf.mxu1 }
 0x65f   :  { %v685_v52 = vadd.f32 %v684_v47, %v626_v10  ;;  %v705_v56 = vadd.f32 %v702_v50, %v693_v49  ;;  %v765_v49 = vsub.s32 2, %v2992_v63 }
 0x660   :  { %v2582_v55 = vpop.f32.mrf.mxu1 }
 0x661   :  { %v703_v57 = vadd.f32 %v702_v50, %v685_v52  ;;  %v696_v58 = vadd.f32 %v2588_v51, %v2582_v55  ;;  %v709_v4 = vadd.f32 %v705_v56, %v2985_v59  ;;  %v766_v10 = vrot.slane %v2998_v1, %v765_v49 }
 0x662   :  { %v629_v12 = vpop.f32.mrf.mxu1  ;;  %v773_v52 = vsub.s32 3, %v2992_v63 }
 0x663   :  { %v688_v62 = vadd.f32 %v687_v61, %v629_v12  ;;  %v707_v2 = vadd.f32 %v703_v57, %v2978_v53  ;;  %v706_v29 = vadd.f32 %v702_v50, %v696_v58  ;;  %v717_v7 = vsel %vm54_vm0, %v709_v4, 0.0 }
 0x664   :  { %v774_v61 = vrot.slane %v2998_v1, %v773_v52 }
 0x665   :  { %v704_v28 = vadd.f32 %v702_v50, %v688_v62  ;;  %v711_v3 = vsel %vm54_vm0, %v707_v2, 0.0  ;;  %v710_v8 = vadd.f32 %v706_v29, %v2987_v60 }
 0x666   :  { %712 = vadd.xlane.f32.xlu0 %v711_v3 }
 0x667   :  { %v708_v5 = vadd.f32 %v704_v28, %v2980_v54  ;;  %v720_v9 = vsel %vm54_vm0, %v710_v8, 0.0 }
 0x669   :  { %v714_v6 = vsel %vm54_vm0, %v708_v5, 0.0 }
 0x66a   :  { %715 = vadd.xlane.f32.xlu1 %v714_v6  ;;  %718 = vadd.xlane.f32.xlu0 %v717_v7 }
 0x66e   :  { %721 = vadd.xlane.f32.xlu0 %v720_v9 }
 0x6ef   :  { %v713_v53 = vpop.xlane.xlu0 %712 }
 0x6f0   :  { %v723_v11 = vmul.f32 0.03125, %v713_v53 }
 0x6f2   :  { %v727_v13 = vsub.f32 %v707_v2, %v723_v11 }
 0x6f3   :  { %v716_v14 = vpop.xlane.xlu1 %715  ;;  %v719_v15 = vpop.xlane.xlu0 %718 }
 0x6f4   :  { %v724_v59 = vmul.f32 0.03125, %v716_v14  ;;  %v725_v16 = vmul.f32 0.03125, %v719_v15  ;;  %v731_v17 = vmul.f32 %v727_v13, %v727_v13  ;;  %v783_v15 = vsub.s32 4, %v2992_v63 }
 0x6f6   :  { %v728_v54 = vsub.f32 %v708_v5, %v724_v59  ;;  %v729_v19 = vsub.f32 %v709_v4, %v725_v16  ;;  %v735_v20 = vsel %vm54_vm0, %v731_v17, 0.0  ;;  %v784_v59 = vrot.slane %v2998_v1, %v783_v15 }
 0x6f7   :  { %736 = vadd.xlane.f32.xlu0 %v735_v20  ;;  %v722_v18 = vpop.xlane.xlu0 %721 }
 0x6f8   :  { %v726_v60 = vmul.f32 0.03125, %v722_v18  ;;  %v732_v21 = vmul.f32 %v728_v54, %v728_v54  ;;  %v733_v22 = vmul.f32 %v729_v19, %v729_v19 }
 0x6fa   :  { %v730_v23 = vsub.f32 %v710_v8, %v726_v60  ;;  %v738_v25 = vsel %vm54_vm0, %v732_v21, 0.0  ;;  %v741_v26 = vsel %vm54_vm0, %v733_v22, 0.0 }
 0x6fb   :  { %739 = vadd.xlane.f32.xlu1 %v738_v25  ;;  %742 = vadd.xlane.f32.xlu0 %v741_v26 }
 0x6fc   :  { %v734_v30 = vmul.f32 %v730_v23, %v730_v23 }
 0x6fe   :  { %v744_v31 = vsel %vm54_vm0, %v734_v30, 0.0 }
 0x6ff   :  { %745 = vadd.xlane.f32.xlu1 %v744_v31 }
 0x710   :  { %890 = vrot.lane.b32.xlu1 %v2714_v34, %s2859_s23 }
 0x711   :  { %892 = vrot.lane.b32.xlu0 %v2713_v32, %s2859_s23 }
 0x780   :  { %v737_v35 = vpop.xlane.xlu0 %736 }
 0x781   :  { %v747_v36 = vmul.f32 0.03125, %v737_v35 }
 0x783   :  { %v751_v37 = vadd.f32 1e-12, %v747_v36 }
 0x784   :  { %v740_v39 = vpop.xlane.xlu1 %739  ;;  %v743_v40 = vpop.xlane.xlu0 %742 }
 0x785   :  { %2765 = vrsqrt.f32 %v751_v37  ;;  %v748_v41 = vmul.f32 0.03125, %v740_v39  ;;  %v749_v42 = vmul.f32 0.03125, %v743_v40 }
 0x787   :  { %v752_v43 = vadd.f32 1e-12, %v748_v41  ;;  %v753_v44 = vadd.f32 1e-12, %v749_v42 }
 0x788   :  { %v746_v45 = vpop.xlane.xlu1 %745  ;;  %v893_v53 = vpop.permute.xlu0 %892 }
 0x789   :  { %2767 = vrsqrt.f32 %v752_v43  ;;  %v750_v47 = vmul.f32 0.03125, %v746_v45  ;;  %v905_v11 = vsel %vm894_vm2, %v893_v53, 0  ;;  %2693 = vmatprep.subr.msk.bf16.mxu0 %vm894_vm2, %v893_v53 }
 0x78a   :  { %2769 = vrsqrt.f32 %v753_v44  ;;  %2598 = vmatpush3.bf16.xpose.msra.mxu0 %v905_v11 }
 0x78b   :  { %v754_v48 = vadd.f32 1e-12, %v750_v47 }
 0x78d   :  { %2771 = vrsqrt.f32 %v754_v48 }
 0x792   :  { %v2766_v50 = vpop.eup %2765 }
 0x793   :  { %v759_v51 = vmul.f32 %v2766_v50, %v727_v13  ;;  %v891_v13 = vpop.permute.xlu1 %890 }
 0x794   :  { %v902_v14 = vsel %vm894_vm2, %v891_v13, 0  ;;  %2694 = vmatprep.subr.msk.bf16.mxu0 %vm894_vm2, %v891_v13  ;;  %v888_v13 = vsub.s32 5, %v2992_v63 }
 0x795   :  { %v767_v58 = vmul.f32 %v766_v10, %v759_v51  ;;  %2600 = vmatpush3.bf16.xpose.msra.mxu0 %v902_v14 }
 0x796   :  { %v2768_v55 = vpop.eup %2767 }
 0x797   :  { %v2770_v56 = vpop.eup %2769  ;;  %v760_v57 = vmul.f32 %v2768_v55, %v728_v54  ;;  %v3145_v28 = vadd.f32 %v774_v61, %v767_v58 }
 0x798   :  { %v761_v12 = vmul.f32 %v2770_v56, %v729_v19 }
 0x799   :  { %v768_v62 = vmul.f32 %v766_v10, %v760_v57 }
 0x79a   :  { %v2772_v2 = vpop.eup %2771  ;;  %v769_v4 = vmul.f32 %v766_v10, %v761_v12 }
 0x79b   :  { %v762_v29 = vmul.f32 %v2772_v2, %v730_v23  ;;  %v3147_v3 = vadd.f32 %v774_v61, %v768_v62 }
 0x79c   :  { %v3152_v7 = vadd.f32 %v774_v61, %v769_v4 }
 0x79d   :  { %v779_v5 = vpack.c.bf16 %v3147_v3, %v3145_v28  ;;  %v770_v6 = vmul.f32 %v766_v10, %v762_v29 }
 0x79f   :  { %2593 = vmatprep.mubr.msk.bf16.mxu1 %vm54_vm0, %v779_v5  ;;  %v3154_v8 = vadd.f32 %v774_v61, %v770_v6 }
 0x7a1   :  { %v780_v9 = vpack.c.bf16 %v3154_v8, %v3152_v7 }
 0x7a3   :  { %2594 = vmatmul.mubr.msk.bf16.vlgmr.msra.gmra.mxu1 %vm54_vm0, %v780_v9 }
 0x863   :  { %v2595_v16 = vpop.f32.mrf.mxu1 }
 0x864   :  { %v842_v17 = vadd.f32 %v2595_v16, %v784_v59 }
 0x865   :  { %v833_v54 = vpop.f32.mrf.mxu1 }
 0x866   :  { %v850_v19 = vmul.f32 %v842_v17, %v842_v17  ;;  %v834_v20 = vadd.f32 %v833_v54, %v784_v59 }
 0x867   :  { %v2596_v18 = vpop.f32.mrf.mxu1 }
 0x868   :  { %v854_v60 = vmul.f32 %v850_v19, %v842_v17  ;;  %v848_v21 = vmul.f32 %v834_v20, %v834_v20  ;;  %v845_v22 = vadd.f32 %v2596_v18, %v784_v59 }
 0x869   :  { %v836_v23 = vpop.f32.mrf.mxu1 }
 0x86a   :  { %v858_v25 = vmul.f32 0.044715, %v854_v60  ;;  %v852_v26 = vmul.f32 %v848_v21, %v834_v20  ;;  %v851_v30 = vmul.f32 %v845_v22, %v845_v22  ;;  %v837_v31 = vadd.f32 %v836_v23, %v784_v59 }
 0x86b   :  { %v889_v59 = vrot.slane %v2998_v1, %v888_v13 }
 0x86c   :  { %v862_v32 = vadd.f32 %v858_v25, %v842_v17  ;;  %v856_v34 = vmul.f32 0.044715, %v852_v26  ;;  %v855_v35 = vmul.f32 %v851_v30, %v845_v22  ;;  %v849_v36 = vmul.f32 %v837_v31, %v837_v31 }
 0x86e   :  { %v866_v37 = vmul.f32 0.7978846, %v862_v32  ;;  %v860_v39 = vadd.f32 %v856_v34, %v834_v20  ;;  %v859_v40 = vmul.f32 0.044715, %v855_v35  ;;  %v853_v41 = vmul.f32 %v849_v36, %v837_v31 }
 0x870   :  { %v864_v42 = vmul.f32 0.7978846, %v860_v39  ;;  %v863_v43 = vadd.f32 %v859_v40, %v845_v22  ;;  %v857_v44 = vmul.f32 0.044715, %v853_v41  ;;  %2773 = vtanh.f32 %v866_v37 }
 0x872   :  { %2775 = vtanh.f32 %v864_v42  ;;  %v867_v45 = vmul.f32 0.7978846, %v863_v43  ;;  %v861_v47 = vadd.f32 %v857_v44, %v837_v31 }
 0x874   :  { %2777 = vtanh.f32 %v867_v45  ;;  %v865_v48 = vmul.f32 0.7978846, %v861_v47 }
 0x876   :  { %2779 = vtanh.f32 %v865_v48 }
 0x87d   :  { %v2774_v50 = vpop.eup %2773 }
 0x87e   :  { %v874_v56 = vadd.f32 1.0, %v2774_v50 }
 0x87f   :  { %v2776_v51 = vpop.eup %2775 }
 0x880   :  { %v872_v10 = vadd.f32 1.0, %v2776_v51  ;;  %v878_v2 = vmul.f32 0.5, %v874_v56  ;;  %v3194_v56 = vld [vmem:[%s3552_s4 + $0x20] ss:$8 sps:$4 sm:$0xff]  }
 0x881   :  { %v2778_v55 = vpop.eup %2777 }
 0x882   :  { %v875_v57 = vadd.f32 1.0, %v2778_v55  ;;  %v876_v61 = vmul.f32 0.5, %v872_v10  ;;  %v882_v9 = vmul.f32 %v878_v2, %v842_v17  ;;  %v3188_v55 = vld [vmem:[%s3552_s4 + $0x30] ss:$8 sps:$4 sm:$0xff]  }
 0x883   :  { %v2780_v58 = vpop.eup %2779  ;;  %2605 = vmatprep.subr.bf16.mxu1 %v3188_v55 }
 0x884   :  { %v879_v12 = vmul.f32 0.5, %v875_v57  ;;  %v873_v62 = vadd.f32 1.0, %v2780_v58  ;;  %v880_v5 = vmul.f32 %v876_v61, %v834_v20  ;;  %2606 = vmatpush3.bf16.msra.mxu1 %v3188_v55 }
 0x885   :  { %2607 = vmatprep.subr.bf16.mxu1 %v3194_v56 }
 0x886   :  { %v877_v29 = vmul.f32 0.5, %v873_v62  ;;  %v883_v4 = vmul.f32 %v879_v12, %v845_v22 }
 0x888   :  { %v881_v6 = vmul.f32 %v877_v29, %v837_v31  ;;  %v885_v11 = vpack.c.bf16 %v883_v4, %v882_v9  ;;  %2608 = vmatpush3.bf16.msra.mxu1 %v3194_v56 }
 0x88a   :  { %v884_v53 = vpack.c.bf16 %v881_v6, %v880_v5 }
 0x88c   :  { %2601 = vmatprep.mubr.msk.bf16.mxu0 %vm894_vm2, %v884_v53 }
 0x88d   :  { %2602 = vmatmul.mubr.msk.bf16.vlgmr.msra.gmra.mxu0 %vm894_vm2, %v885_v11  ;;  %v1014_v11 = vsub.s32 6, %v2992_v63 }
 0x94d   :  { %v2603_v14 = vpop.f32.mrf.mxu0 }
 0x94e   :  { %v950_v60 = vadd.f32 %v2603_v14, %v889_v59 }
 0x94f   :  { %v941_v16 = vpop.f32.mrf.mxu0 }
 0x950   :  { %v942_v54 = vadd.f32 %v941_v16, %v889_v59  ;;  %v958_v31 = vadd.f32 %v950_v60, %v3152_v7  ;;  %v1015_v16 = vrot.slane %v2998_v1, %v1014_v11 }
 0x951   :  { %v2604_v19 = vpop.f32.mrf.mxu0 }
 0x952   :  { %v953_v18 = vadd.f32 %v2604_v19, %v889_v59  ;;  %v956_v20 = vadd.f32 %v942_v54, %v3145_v28  ;;  %v966_v28 = vsel %vm54_vm0, %v958_v31, 0.0  ;;  %v1022_v54 = vsub.s32 7, %v2992_v63 }
 0x953   :  { %v944_v17 = vpop.f32.mrf.mxu0 }
 0x954   :  { %v945_v21 = vadd.f32 %v944_v17, %v889_v59  ;;  %v960_v22 = vsel %vm54_vm0, %v956_v20, 0.0  ;;  %v959_v23 = vadd.f32 %v953_v18, %v3154_v8  ;;  %v1023_v17 = vrot.slane %v2998_v1, %v1022_v54 }
 0x955   :  { %961 = vadd.xlane.f32.xlu1 %v960_v22 }
 0x956   :  { %v957_v25 = vadd.f32 %v945_v21, %v3147_v3  ;;  %v969_v30 = vsel %vm54_vm0, %v959_v23, 0.0 }
 0x958   :  { %v963_v26 = vsel %vm54_vm0, %v957_v25, 0.0 }
 0x959   :  { %964 = vadd.xlane.f32.xlu0 %v963_v26  ;;  %970 = vadd.xlane.f32.xlu1 %v969_v30 }
 0x95d   :  { %967 = vadd.xlane.f32.xlu0 %v966_v28 }
 0x9de   :  { %v962_v32 = vpop.xlane.xlu1 %961 }
 0x9df   :  { %v972_v34 = vmul.f32 0.03125, %v962_v32 }
 0x9e1   :  { %v976_v35 = vsub.f32 %v956_v20, %v972_v34 }
 0x9e2   :  { %v965_v36 = vpop.xlane.xlu0 %964  ;;  %v971_v37 = vpop.xlane.xlu1 %970 }
 0x9e3   :  { %v973_v8 = vmul.f32 0.03125, %v965_v36  ;;  %v975_v39 = vmul.f32 0.03125, %v971_v37  ;;  %v980_v40 = vmul.f32 %v976_v35, %v976_v35  ;;  %v3224_v36 = vld [vmem:[%s3555_s5 + $0x8] sm:$0xff] }
 0x9e5   :  { %v977_v3 = vsub.f32 %v957_v25, %v973_v8  ;;  %v979_v41 = vsub.f32 %v959_v23, %v975_v39  ;;  %v984_v42 = vsel %vm54_vm0, %v980_v40, 0.0  ;;  %v1040_v8 = vrot.slane %v3224_v36, %v141_v0 }
 0x9e6   :  { %v968_v43 = vpop.xlane.xlu0 %967  ;;  %985 = vadd.xlane.f32.xlu0 %v984_v42 }
 0x9e7   :  { %v974_v7 = vmul.f32 0.03125, %v968_v43  ;;  %v981_v44 = vmul.f32 %v977_v3, %v977_v3  ;;  %v983_v48 = vmul.f32 %v979_v41, %v979_v41 }
 0x9e9   :  { %v978_v45 = vsub.f32 %v958_v31, %v974_v7  ;;  %v987_v47 = vsel %vm54_vm0, %v981_v44, 0.0  ;;  %v993_v10 = vsel %vm54_vm0, %v983_v48, 0.0 }
 0x9ea   :  { %988 = vadd.xlane.f32.xlu1 %v987_v47 }
 0x9eb   :  { %v982_v50 = vmul.f32 %v978_v45, %v978_v45 }
 0x9ed   :  { %v990_v51 = vsel %vm54_vm0, %v982_v50, 0.0 }
 0x9ee   :  { %991 = vadd.xlane.f32.xlu0 %v990_v51  ;;  %994 = vadd.xlane.f32.xlu1 %v993_v10 }
 0xa6f   :  { %v986_v57 = vpop.xlane.xlu0 %985 }
 0xa70   :  { %v996_v58 = vmul.f32 0.03125, %v986_v57 }
 0xa72   :  { %v1000_v61 = vadd.f32 1e-12, %v996_v58 }
 0xa73   :  { %v989_v12 = vpop.xlane.xlu1 %988 }
 0xa74   :  { %2781 = vrsqrt.f32 %v1000_v61  ;;  %v997_v62 = vmul.f32 0.03125, %v989_v12 }
 0xa76   :  { %v1001_v2 = vadd.f32 1e-12, %v997_v62 }
 0xa77   :  { %v992_v29 = vpop.xlane.xlu0 %991  ;;  %v995_v4 = vpop.xlane.xlu1 %994 }
 0xa78   :  { %2783 = vrsqrt.f32 %v1001_v2  ;;  %v998_v5 = vmul.f32 0.03125, %v992_v29  ;;  %v999_v6 = vmul.f32 0.03125, %v995_v4 }
 0xa7a   :  { %v1002_v9 = vadd.f32 1e-12, %v998_v5  ;;  %v1003_v53 = vadd.f32 1e-12, %v999_v6 }
 0xa7c   :  { %2785 = vrsqrt.f32 %v1002_v9 }
 0xa7d   :  { %2787 = vrsqrt.f32 %v1003_v53 }
 0xa81   :  { %v2782_v14 = vpop.eup %2781 }
 0xa82   :  { %v1008_v59 = vmul.f32 %v2782_v14, %v976_v35 }
 0xa84   :  { %v1016_v20 = vmul.f32 %v1015_v16, %v1008_v59 }
 0xa85   :  { %v2784_v19 = vpop.eup %2783 }
 0xa86   :  { %v1009_v18 = vmul.f32 %v2784_v19, %v977_v3  ;;  %v3207_v25 = vadd.f32 %v1023_v17, %v1016_v20 }
 0xa88   :  { %v1017_v60 = vmul.f32 %v1015_v16, %v1009_v18 }
 0xa89   :  { %v2786_v21 = vpop.eup %2785 }
 0xa8a   :  { %v2788_v22 = vpop.eup %2787  ;;  %v1010_v23 = vmul.f32 %v2786_v21, %v978_v45  ;;  %v3209_v26 = vadd.f32 %v1023_v17, %v1017_v60 }
 0xa8b   :  { %v1011_v30 = vmul.f32 %v2788_v22, %v979_v41 }
 0xa8c   :  { %v1035_v31 = vpack.c.bf16 %v3209_v26, %v3207_v25  ;;  %v1018_v28 = vmul.f32 %v1015_v16, %v1010_v23 }
 0xa8d   :  { %v1019_v32 = vmul.f32 %v1015_v16, %v1011_v30 }
 0xa8e   :  { %2609 = vmatprep.mubr.msk.bf16.mxu1 %vm54_vm0, %v1035_v31  ;;  %v3214_v34 = vadd.f32 %v1023_v17, %v1018_v28 }
 0xa8f   :  { %v3216_v35 = vadd.f32 %v1023_v17, %v1019_v32 }
 0xa91   :  { %v1036_v1 = vpack.c.bf16 %v3216_v35, %v3214_v34 }
 0xa93   :  { %2610 = vmatmul.mubr.msk.bf16.vlgmr.msra.gmra.mxu1 %vm54_vm0, %v1036_v1 }
 0xb53   :  { %v2611_v37 = vpop.f32.mrf.mxu1 }
 0xb54   :  { %v1102_v3 = vadd.f32 %v2611_v37, %v1040_v8 }
 0xb55   :  { %v1093_v39 = vpop.f32.mrf.mxu1 }
 0xb56   :  { %v1094_v43 = vadd.f32 %v1093_v39, %v1040_v8 }
 0xb57   :  { %v2612_v40 = vpop.f32.mrf.mxu1 }
 0xb58   :  { %v1105_v41 = vadd.f32 %v2612_v40, %v1040_v8 }
 0xb59   :  { %v1096_v42 = vpop.f32.mrf.mxu1 }
 0xb5a   :  { %v3229_v7 = vpack.c.bf16 %v1105_v41, %v1102_v3  ;;  %v1097_v44 = vadd.f32 %v1096_v42, %v1040_v8 }
 0xb5c   :  { %v3231_v45 = vpack.c.bf16 %v1097_v44, %v1094_v43  ;;  %1114 = vrot.lane.b32.xlu0 %v3229_v7, %s2855_s28 }
 0xb5e   :  { %1112 = vrot.lane.b32.xlu1 %v3231_v45, %s2855_s28  ;;  %2617 = vmatprep.mubr.msk.bf16.mxu1 %vm218_vm1, %v3231_v45 }
 0xbce   :  { %v1115_v0 = vpop.permute.xlu0 %1114 }
 0xbcf   :  { %v1126_v47 = vsel %vm218_vm1, %v1115_v0, 0  ;;  %2695 = vmatprep.subr.msk.bf16.mxu1 %vm218_vm1, %v1115_v0 }
 0xbd0   :  { %2614 = vmatpush3.bf16.xpose.msra.mxu1 %v1126_v47  ;;  %v1113_v48 = vpop.permute.xlu1 %1112 }
 0xbd1   :  { %2696 = vmatprep.subr.msk.bf16.mxu1 %vm218_vm1, %v1113_v48  ;;  %v1123_v50 = vsel %vm218_vm1, %v1113_v48, 0 }
 0xbd8   :  { %2616 = vmatpush3.bf16.xpose.msra.mxu1 %v1123_v50 }
 0xbdf   :  { %2618 = vmatmul.mubr.msk.bf16.vlgmr.msra.gmra.mxu1 %vm218_vm1, %v3229_v7 }
 0xc9f   :  { %v2619_v51 = vpop.f32.mrf.mxu1 }
 0xca0   :  { %v1179_v2 = vmul.f32 0.25, %v2619_v51 }
 0xca1   :  { %v1162_v10 = vpop.f32.mrf.mxu1 }
 0xca2   :  { %v1177_v57 = vmul.f32 0.25, %v1162_v10  ;;  %v1183_v14 = vadd.f32 %v1179_v2, %v3036_v24 }
 0xca3   :  { %v2620_v58 = vpop.f32.mrf.mxu1 }
 0xca4   :  { %v1180_v61 = vmul.f32 0.25, %v2620_v58  ;;  %v1181_v12 = vadd.f32 %v1177_v57, %v3041_v27  ;;  %v1191_v27 = vsel %vm54_vm0, %v1183_v14, -inf }
 0xca5   :  { %v1165_v62 = vpop.f32.mrf.mxu1 }
 0xca6   :  { %v1178_v29 = vmul.f32 0.25, %v1165_v62  ;;  %v1185_v4 = vsel %vm54_vm0, %v1181_v12, -inf  ;;  %v1184_v5 = vadd.f32 %v1180_v61, %v3047_v33 }
 0xca7   :  { %1186 = vmax.xlane.f32.xlu1 %v1185_v4 }
 0xca8   :  { %v1182_v6 = vadd.f32 %v1178_v29, %v3054_v38  ;;  %v1194_v9 = vsel %vm54_vm0, %v1184_v5, -inf }
 0xcaa   :  { %v1188_v53 = vsel %vm54_vm0, %v1182_v6, -inf }
 0xcab   :  { %1195 = vmax.xlane.f32.xlu1 %v1194_v9  ;;  %1189 = vmax.xlane.f32.xlu0 %v1188_v53 }
 0xcaf   :  { %1192 = vmax.xlane.f32.xlu0 %v1191_v27 }
 0xcbc   :  { %1231 = vrot.lane.b32.xlu1 %v3231_v45, %s2859_s23 }
 0xd30   :  { %v1187_v59 = vpop.xlane.xlu1 %1186 }
 0xd31   :  { %v1197_v38 = vsub.f32 %v1181_v12, %v1187_v59 }
 0xd33   :  { %v1201_v24 = vmul.f32 1.442695, %v1197_v38 }
 0xd34   :  { %v1196_v16 = vpop.xlane.xlu1 %1195  ;;  %v1190_v33 = vpop.xlane.xlu0 %1189 }
 0xd35   :  { %v1200_v19 = vsub.f32 %v1184_v5, %v1196_v16  ;;  %v1198_v18 = vsub.f32 %v1182_v6, %v1190_v33 }
 0xd37   :  { %v1207_v20 = vmul.f32 1.442695, %v1200_v19  ;;  %v1203_v17 = vmul.f32 1.442695, %v1198_v18 }
 0xd38   :  { %v1193_v60 = vpop.xlane.xlu0 %1192  ;;  %v1232_v39 = vpop.permute.xlu1 %1231 }
 0xd39   :  { %2789 = vpow2.f32 %v1207_v20  ;;  %v1199_v21 = vsub.f32 %v1183_v14, %v1193_v60  ;;  %v2851_v20 = vld [vmem:[%s3556_s1] sm:$0xff] }
 0xd3a   :  { %2791 = vpow2.f32 %v1203_v17 }
 0xd3b   :  { %v1205_v22 = vmul.f32 1.442695, %v1199_v21 }
 0xd3d   :  { %2793 = vpow2.f32 %v1205_v22 }
 0xd3e   :  { %2795 = vpow2.f32 %v1201_v24 }
 0xd46   :  { %v2790_v23 = vpop.eup %2789 }
 0xd47   :  { %v1218_v30 = vsel %vm54_vm0, %v2790_v23, 0.0  ;;  %v2792_v31 = vpop.eup %2791 }
 0xd48   :  { %1219 = vadd.xlane.f32.xlu1 %v1218_v30  ;;  %v1212_v32 = vsel %vm54_vm0, %v2792_v31, 0.0 }
 0xd4a   :  { %v2794_v28 = vpop.eup %2793 }
 0xd4b   :  { %v1215_v1 = vsel %vm54_vm0, %v2794_v28, 0.0  ;;  %v2796_v37 = vpop.eup %2795 }
 0xd4c   :  { %1213 = vadd.xlane.f32.xlu1 %v1212_v32  ;;  %1216 = vadd.xlane.f32.xlu0 %v1215_v1  ;;  %v1209_v8 = vsel %vm54_vm0, %v2796_v37, 0.0 }
 0xd50   :  { %1210 = vadd.xlane.f32.xlu0 %v1209_v8 }
 0xd5d   :  { %1300 = vrot.lane.b32.xlu1 %v3229_v7, %s2857_s30 }
 0xd61   :  { %1298 = vrot.lane.b32.xlu1 %v3231_v45, %s2857_s30 }
 0xd65   :  { %1296 = vrot.lane.b32.xlu1 %v3229_v7, %s2856_s29 }
 0xd66   :  { %1233 = vrot.lane.b32.xlu0 %v3229_v7, %s2859_s23 }
 0xd6a   :  { %1294 = vrot.lane.b32.xlu0 %v3231_v45, %s2856_s29 }
 0xdd1   :  { %v1220_v40 = vpop.xlane.xlu1 %1219 }
 0xdd5   :  { %v1214_v3 = vpop.xlane.xlu1 %1213  ;;  %v1217_v41 = vpop.xlane.xlu0 %1216 }
 0xdd6   :  { %2797 = vrcp.f32 %v1217_v41 }
 0xdd7   :  { %2799 = vrcp.f32 %v1214_v3 }
 0xdd8   :  { %2801 = vrcp.f32 %v1220_v40 }
 0xdd9   :  { %v1211_v42 = vpop.xlane.xlu0 %1210  ;;  %v1301_v44 = vpop.permute.xlu1 %1300 }
 0xdda   :  { %2803 = vrcp.f32 %v1211_v42  ;;  %v1312_v62 = vsel %vm218_vm1, %v1301_v44, 0 }
 0xddd   :  { %v1234_v43 = vpop.permute.xlu0 %1233  ;;  %v1299_v29 = vpop.permute.xlu1 %1298 }
 0xdde   :  { %2621 = vmatprep.subr.bf16.mxu0 %v1234_v43  ;;  %v1309_v4 = vsel %vm218_vm1, %v1299_v29, 0 }
 0xddf   :  { %2622 = vmatpush3.bf16.msra.mxu0 %v1234_v43 }
 0xde0   :  { %2623 = vmatprep.subr.bf16.mxu0 %v1232_v39 }
 0xde1   :  { %v1295_v2 = vpop.permute.xlu0 %1294  ;;  %v1297_v5 = vpop.permute.xlu1 %1296 }
 0xde3   :  { %2624 = vmatpush3.bf16.msra.mxu0 %v1232_v39  ;;  %v2798_v0 = vpop.eup %2797 }
 0xde4   :  { %2697 = vmatprep.subr.msk.bf16.mxu0 %vm218_vm1, %v1301_v44  ;;  %v2800_v47 = vpop.eup %2799  ;;  %v1227_v51 = vmul.f32 %v2798_v0, %v2794_v28 }
 0xde5   :  { %v2802_v48 = vpop.eup %2801  ;;  %v1226_v57 = vmul.f32 %v2800_v47, %v2792_v31  ;;  %v2853_v31 = vld [vmem:[%s3556_s1 + $0x8] sm:$0xff] }
 0xde6   :  { %v1228_v58 = vmul.f32 %v2802_v48, %v2790_v23  ;;  %v2852_v23 = vld [vmem:[%s3556_s1 + $0x10] sm:$0xff] }
 0xde7   :  { %v2804_v50 = vpop.eup %2803 }
 0xde8   :  { %v1225_v10 = vmul.f32 %v2804_v50, %v2796_v37  ;;  %v1230_v12 = vpack.c.bf16 %v1228_v58, %v1227_v51  ;;  %v2854_v37 = vld [vmem:[%s3556_s1 + $0x18] sm:$0xff] }
 0xdea   :  { %v1229_v61 = vpack.c.bf16 %v1226_v57, %v1225_v10 }
 0xdec   :  { %2625 = vmatprep.mubr.msk.bf16.mxu0 %vm54_vm0, %v1229_v61 }
 0xded   :  { %2626 = vmatmul.mubr.msk.bf16.vlgmr.msra.gmra.mxu0 %vm54_vm0, %v1230_v12 }
 0xdee   :  { %2630 = vmatpush3.bf16.xpose.msra.mxu0 %v1312_v62  ;;  %2633 = vmatprep.mubr.msk.bf16.mxu0 %vm218_vm1, %v1295_v2 }
 0xdef   :  { %2698 = vmatprep.subr.msk.bf16.mxu0 %vm218_vm1, %v1299_v29 }
 0xdf6   :  { %2632 = vmatpush3.bf16.xpose.msra.mxu0 %v1309_v4 }
 0xdfd   :  { %2634 = vmatmul.mubr.msk.bf16.vlgmr.msra.gmra.mxu0 %vm218_vm1, %v1297_v5 }
 0xead   :  { %v3277_v6 = vpop.f32.mrf.mxu0 }
 0xeaf   :  { %v1277_v9 = vpop.f32.mrf.mxu0 }
 0xeb1   :  { %v3279_v53 = vpop.f32.mrf.mxu0 }
 0xeb2   :  { %v1293_v14 = vpack.c.bf16 %v3279_v53, %v3277_v6 }
 0xeb3   :  { %v1280_v27 = vpop.f32.mrf.mxu0 }
 0xeb4   :  { %v1292_v59 = vpack.c.bf16 %v1280_v27, %v1277_v9 }
 0xeb6   :  { %2653 = vmatprep.mubr.msk.bf16.mxu0 %vm218_vm1, %v1292_v59 }
 0xebd   :  { %v2635_v16 = vpop.f32.mrf.mxu0 }
 0xebe   :  { %v1365_v19 = vmul.f32 0.25, %v2635_v16 }
 0xebf   :  { %v1348_v33 = vpop.f32.mrf.mxu0 }
 0xec0   :  { %v1363_v18 = vmul.f32 0.25, %v1348_v33  ;;  %v1369_v30 = vadd.f32 %v2852_v23, %v1365_v19 }
 0xec1   :  { %v2636_v38 = vpop.f32.mrf.mxu0 }
 0xec2   :  { %v1367_v17 = vadd.f32 %v2851_v20, %v1363_v18  ;;  %v1366_v21 = vmul.f32 0.25, %v2636_v38  ;;  %v1377_v32 = vsel %vm54_vm0, %v1369_v30, -inf }
 0xec3   :  { %v1351_v60 = vpop.f32.mrf.mxu0 }
 0xec4   :  { %v1364_v24 = vmul.f32 0.25, %v1351_v60  ;;  %v1371_v22 = vsel %vm54_vm0, %v1367_v17, -inf  ;;  %v1370_v8 = vadd.f32 %v2854_v37, %v1366_v21  ;;  %v1599_v37 = vrot.slane %v3224_v36, %v701_v46 }
 0xec5   :  { %1372 = vmax.xlane.f32.xlu0 %v1371_v22 }
 0xec6   :  { %v1368_v28 = vadd.f32 %v2853_v31, %v1364_v24  ;;  %v1380_v39 = vsel %vm54_vm0, %v1370_v8, -inf }
 0xec8   :  { %v1374_v1 = vsel %vm54_vm0, %v1368_v28, -inf }
 0xec9   :  { %1378 = vmax.xlane.f32.xlu0 %v1377_v32  ;;  %1375 = vmax.xlane.f32.xlu1 %v1374_v1 }
 0xecd   :  { %1381 = vmax.xlane.f32.xlu0 %v1380_v39 }
 0xf4e   :  { %v1373_v40 = vpop.xlane.xlu0 %1372 }
 0xf4f   :  { %v1383_v3 = vsub.f32 %v1367_v17, %v1373_v40 }
 0xf51   :  { %v1387_v44 = vmul.f32 1.442695, %v1383_v3 }
 0xf52   :  { %v1379_v41 = vpop.xlane.xlu0 %1378  ;;  %v1376_v42 = vpop.xlane.xlu1 %1375 }
 0xf53   :  { %v1385_v43 = vsub.f32 %v1369_v30, %v1379_v41  ;;  %v1384_v47 = vsub.f32 %v1368_v28, %v1376_v42 }
 0xf55   :  { %v1391_v0 = vmul.f32 1.442695, %v1385_v43  ;;  %v1389_v51 = vmul.f32 1.442695, %v1384_v47 }
 0xf56   :  { %v1382_v48 = vpop.xlane.xlu0 %1381 }
 0xf57   :  { %2805 = vpow2.f32 %v1391_v0  ;;  %v1386_v50 = vsub.f32 %v1370_v8, %v1382_v48 }
 0xf58   :  { %2807 = vpow2.f32 %v1387_v44 }
 0xf59   :  { %v1393_v10 = vmul.f32 1.442695, %v1386_v50 }
 0xf5b   :  { %2809 = vpow2.f32 %v1393_v10 }
 0xf5c   :  { %2811 = vpow2.f32 %v1389_v51 }
 0xf64   :  { %v2806_v57 = vpop.eup %2805 }
 0xf65   :  { %v1401_v58 = vsel %vm54_vm0, %v2806_v57, 0.0  ;;  %v2808_v61 = vpop.eup %2807 }
 0xf66   :  { %1402 = vadd.xlane.f32.xlu0 %v1401_v58  ;;  %v1395_v62 = vsel %vm54_vm0, %v2808_v61, 0.0 }
 0xf68   :  { %v2810_v12 = vpop.eup %2809 }
 0xf69   :  { %v1404_v2 = vsel %vm54_vm0, %v2810_v12, 0.0  ;;  %v2812_v29 = vpop.eup %2811 }
 0xf6a   :  { %1396 = vadd.xlane.f32.xlu0 %v1395_v62  ;;  %1405 = vadd.xlane.f32.xlu1 %v1404_v2  ;;  %v1398_v4 = vsel %vm54_vm0, %v2812_v29, 0.0 }
 0xf6e   :  { %1399 = vadd.xlane.f32.xlu1 %v1398_v4 }
 0xf7f   :  { %1417 = vrot.lane.b32.xlu1 %v3231_v45, %s2858_s22 }
 0xf80   :  { %1419 = vrot.lane.b32.xlu0 %v3229_v7, %s2858_s22 }
 0xf83   :  { %1480 = vrot.lane.b32.xlu1 %v3188_v55, %s2860_s24 }
 0xf87   :  { %1538 = vrot.lane.b32.xlu1 %v3194_v56, %s2860_s24 }
 0xfef   :  { %v1403_v5 = vpop.xlane.xlu0 %1402 }
 0xff3   :  { %v1397_v9 = vpop.xlane.xlu0 %1396  ;;  %v1406_v27 = vpop.xlane.xlu1 %1405 }
 0xff4   :  { %2813 = vrcp.f32 %v1406_v27 }
 0xff5   :  { %2815 = vrcp.f32 %v1397_v9 }
 0xff6   :  { %2817 = vrcp.f32 %v1403_v5 }
 0xff7   :  { %v1420_v59 = vpop.permute.xlu0 %1419  ;;  %v1400_v16 = vpop.xlane.xlu1 %1399 }
 0xff8   :  { %2819 = vrcp.f32 %v1400_v16  ;;  %2637 = vmatprep.subr.bf16.mxu1 %v1420_v59 }
 0xff9   :  { %2638 = vmatpush3.bf16.msra.mxu1 %v1420_v59 }
 0xffb   :  { %v1418_v45 = vpop.permute.xlu1 %1417 }
 0xffc   :  { %2639 = vmatprep.subr.bf16.mxu1 %v1418_v45 }
 0xffd   :  { %2640 = vmatpush3.bf16.msra.mxu1 %v1418_v45 }
 0xfff   :  { %v1481_v7 = vpop.permute.xlu1 %1480 }
0x1000   :  { %2645 = vmatprep.subr.bf16.mxu1 %v1481_v7 }
0x1001   :  { %v2814_v55 = vpop.eup %2813 }
0x1002   :  { %v2816_v33 = vpop.eup %2815  ;;  %v1414_v38 = vmul.f32 %v2814_v55, %v2810_v12 }
0x1003   :  { %v1539_v19 = vpop.permute.xlu1 %1538  ;;  %v2818_v56 = vpop.eup %2817  ;;  %v1411_v20 = vmul.f32 %v2816_v33, %v2808_v61 }
0x1004   :  { %2651 = vmatprep.subr.bf16.mxu0 %v1539_v19  ;;  %v1413_v60 = vmul.f32 %v2818_v56, %v2806_v57 }
0x1005   :  { %v2820_v18 = vpop.eup %2819  ;;  %2652 = vmatpush3.bf16.msra.mxu0 %v1539_v19 }
0x1006   :  { %v1412_v17 = vmul.f32 %v2820_v18, %v2812_v29  ;;  %v1416_v24 = vpack.c.bf16 %v1414_v38, %v1413_v60 }
0x1008   :  { %2654 = vmatmul.mubr.msk.bf16.vlgmr.msra.gmra.mxu0 %vm218_vm1, %v1293_v14  ;;  %v1415_v21 = vpack.c.bf16 %v1412_v17, %v1411_v20  ;;  %v2719_v20 = vld [vmem:[%s3552_s4 + $0x34] ss:$8 sps:$4 sm:$0xff]   ;;  %v2720_v17 = vld [vmem:[%s3552_s4 + $0x24] ss:$8 sps:$4 sm:$0xff]  }
0x100a   :  { %2641 = vmatprep.mubr.msk.bf16.mxu1 %vm54_vm0, %v1415_v21 }
0x100b   :  { %2642 = vmatmul.mubr.msk.bf16.vlgmr.msra.gmra.mxu1 %vm54_vm0, %v1416_v24 }
0x100c   :  { %2646 = vmatpush3.bf16.msra.mxu1 %v1481_v7 }
0x100d   :  { %2657 = vmatprep.subr.bf16.mxu1 %v2719_v20 }
0x10c8   :  { %v2655_v6 = vpop.f32.mrf.mxu0 }
0x10ca   :  { %v1581_v53 = vpop.f32.mrf.mxu0 }
0x10cb   :  { %v2643_v22 = vpop.f32.mrf.mxu1 }
0x10cc   :  { %v2656_v8 = vpop.f32.mrf.mxu0 }
0x10cd   :  { %v1463_v23 = vpop.f32.mrf.mxu1 }
0x10ce   :  { %v1584_v44 = vpop.f32.mrf.mxu0 }
0x10cf   :  { %v2644_v30 = vpop.f32.mrf.mxu1 }
0x10d0   :  { %v1479_v32 = vpack.c.bf16 %v2644_v30, %v2643_v22 }
0x10d1   :  { %v1466_v31 = vpop.f32.mrf.mxu1 }
0x10d2   :  { %v1478_v28 = vpack.c.bf16 %v1466_v31, %v1463_v23 }
0x10d4   :  { %2647 = vmatprep.mubr.msk.bf16.mxu1 %vm218_vm1, %v1478_v28 }
0x10d5   :  { %2648 = vmatmul.mubr.msk.bf16.vlgmr.msra.gmra.mxu1 %vm218_vm1, %v1479_v32 }
0x10d6   :  { %2658 = vmatpush3.bf16.msra.mxu1 %v2719_v20 }
0x10d7   :  { %2659 = vmatprep.subr.bf16.mxu1 %v2720_v17 }
0x10da   :  { %2660 = vmatpush3.bf16.msra.mxu1 %v2720_v17 }
0x1195   :  { %v2649_v14 = vpop.f32.mrf.mxu1 }
0x1196   :  { %v1590_v1 = vadd.f32 %v2655_v6, %v2649_v14 }
0x1197   :  { %v1523_v39 = vpop.f32.mrf.mxu1 }
0x1198   :  { %v1582_v40 = vadd.f32 %v1581_v53, %v1523_v39  ;;  %v1602_v41 = vadd.f32 %v1599_v37, %v1590_v1 }
0x1199   :  { %v2650_v3 = vpop.f32.mrf.mxu1 }
0x119a   :  { %v1600_v42 = vadd.f32 %v1599_v37, %v1582_v40  ;;  %v1593_v43 = vadd.f32 %v2656_v8, %v2650_v3  ;;  %v1606_v57 = vadd.f32 %v1602_v41, %v3214_v34  ;;  %v1663_v8 = vrot.slane %v3224_v36, %v765_v49 }
0x119b   :  { %v1526_v0 = vpop.f32.mrf.mxu1 }
0x119c   :  { %v1585_v47 = vadd.f32 %v1584_v44, %v1526_v0  ;;  %v1604_v48 = vadd.f32 %v1600_v42, %v3207_v25  ;;  %v1603_v50 = vadd.f32 %v1599_v37, %v1593_v43  ;;  %v1614_v61 = vsel %vm54_vm0, %v1606_v57, 0.0 }
0x119d   :  { %v1671_v42 = vrot.slane %v3224_v36, %v773_v52 }
0x119e   :  { %v1601_v51 = vadd.f32 %v1599_v37, %v1585_v47  ;;  %v1608_v10 = vsel %vm54_vm0, %v1604_v48, 0.0  ;;  %v1607_v12 = vadd.f32 %v1603_v50, %v3216_v35 }
0x119f   :  { %1609 = vadd.xlane.f32.xlu0 %v1608_v10 }
0x11a0   :  { %v1605_v46 = vadd.f32 %v1601_v51, %v3209_v26  ;;  %v1617_v62 = vsel %vm54_vm0, %v1607_v12, 0.0 }
0x11a2   :  { %v1611_v58 = vsel %vm54_vm0, %v1605_v46, 0.0 }
0x11a3   :  { %1612 = vadd.xlane.f32.xlu1 %v1611_v58  ;;  %1615 = vadd.xlane.f32.xlu0 %v1614_v61 }
0x11a7   :  { %1618 = vadd.xlane.f32.xlu0 %v1617_v62 }
0x1228   :  { %v1610_v25 = vpop.xlane.xlu0 %1609 }
0x1229   :  { %v1620_v2 = vmul.f32 0.03125, %v1610_v25  ;;  %v1681_v25 = vrot.slane %v3224_v36, %v783_v15 }
0x122b   :  { %v1624_v29 = vsub.f32 %v1604_v48, %v1620_v2 }
0x122c   :  { %v1613_v4 = vpop.xlane.xlu1 %1612  ;;  %v1616_v5 = vpop.xlane.xlu0 %1615 }
0x122d   :  { %v1621_v34 = vmul.f32 0.03125, %v1613_v4  ;;  %v1622_v9 = vmul.f32 0.03125, %v1616_v5  ;;  %v1628_v27 = vmul.f32 %v1624_v29, %v1624_v29 }
0x122f   :  { %v1625_v26 = vsub.f32 %v1605_v46, %v1621_v34  ;;  %v1626_v59 = vsub.f32 %v1606_v57, %v1622_v9  ;;  %v1632_v16 = vsel %vm54_vm0, %v1628_v27, 0.0 }
0x1230   :  { %1633 = vadd.xlane.f32.xlu0 %v1632_v16  ;;  %v1619_v45 = vpop.xlane.xlu0 %1618 }
0x1231   :  { %v1623_v35 = vmul.f32 0.03125, %v1619_v45  ;;  %v1629_v7 = vmul.f32 %v1625_v26, %v1625_v26  ;;  %v1630_v55 = vmul.f32 %v1626_v59, %v1626_v59 }
0x1233   :  { %v1627_v33 = vsub.f32 %v1607_v12, %v1623_v35  ;;  %v1635_v19 = vsel %vm54_vm0, %v1629_v7, 0.0  ;;  %v1638_v56 = vsel %vm54_vm0, %v1630_v55, 0.0 }
0x1234   :  { %1636 = vadd.xlane.f32.xlu1 %v1635_v19  ;;  %1639 = vadd.xlane.f32.xlu0 %v1638_v56 }
0x1235   :  { %v1631_v18 = vmul.f32 %v1627_v33, %v1627_v33 }
0x1237   :  { %v1641_v38 = vsel %vm54_vm0, %v1631_v18, 0.0 }
0x1238   :  { %1642 = vadd.xlane.f32.xlu1 %v1641_v38 }
0x1249   :  { %1787 = vrot.lane.b32.xlu1 %v2720_v17, %s2859_s23 }
0x124a   :  { %1789 = vrot.lane.b32.xlu0 %v2719_v20, %s2859_s23 }
0x12b9   :  { %v1634_v60 = vpop.xlane.xlu0 %1633 }
0x12ba   :  { %v1644_v21 = vmul.f32 0.03125, %v1634_v60 }
0x12bc   :  { %v1648_v24 = vadd.f32 1e-12, %v1644_v21 }
0x12bd   :  { %v1637_v22 = vpop.xlane.xlu1 %1636  ;;  %v1640_v23 = vpop.xlane.xlu0 %1639 }
0x12be   :  { %2821 = vrsqrt.f32 %v1648_v24  ;;  %v1645_v30 = vmul.f32 0.03125, %v1637_v22  ;;  %v1646_v31 = vmul.f32 0.03125, %v1640_v23 }
0x12c0   :  { %v1649_v28 = vadd.f32 1e-12, %v1645_v30  ;;  %v1650_v32 = vadd.f32 1e-12, %v1646_v31 }
0x12c1   :  { %v1643_v6 = vpop.xlane.xlu1 %1642  ;;  %v1790_v58 = vpop.permute.xlu0 %1789 }
0x12c2   :  { %2823 = vrsqrt.f32 %v1649_v28  ;;  %v1647_v53 = vmul.f32 0.03125, %v1643_v6  ;;  %v1801_v61 = vsel %vm894_vm2, %v1790_v58, 0  ;;  %2699 = vmatprep.subr.msk.bf16.mxu0 %vm894_vm2, %v1790_v58 }
0x12c3   :  { %2825 = vrsqrt.f32 %v1650_v32  ;;  %2666 = vmatpush3.bf16.xpose.msra.mxu0 %v1801_v61 }
0x12c4   :  { %v1651_v14 = vadd.f32 1e-12, %v1647_v53 }
0x12c5   :  { %v1788_v12 = vpop.permute.xlu1 %1787 }
0x12c6   :  { %2827 = vrsqrt.f32 %v1651_v14  ;;  %v1798_v62 = vsel %vm894_vm2, %v1788_v12, 0  ;;  %2700 = vmatprep.subr.msk.bf16.mxu0 %vm894_vm2, %v1788_v12 }
0x12cb   :  { %v2822_v1 = vpop.eup %2821  ;;  %2668 = vmatpush3.bf16.xpose.msra.mxu0 %v1798_v62 }
0x12cc   :  { %v1656_v37 = vmul.f32 %v2822_v1, %v1624_v29 }
0x12ce   :  { %v1664_v41 = vmul.f32 %v1663_v8, %v1656_v37 }
0x12cf   :  { %v2824_v39 = vpop.eup %2823 }
0x12d0   :  { %v2826_v40 = vpop.eup %2825  ;;  %v1657_v3 = vmul.f32 %v2824_v39, %v1625_v26  ;;  %v3349_v48 = vadd.f32 %v1671_v42, %v1664_v41 }
0x12d1   :  { %v1658_v43 = vmul.f32 %v2826_v40, %v1626_v59 }
0x12d2   :  { %v1665_v44 = vmul.f32 %v1663_v8, %v1657_v3 }
0x12d3   :  { %v2828_v0 = vpop.eup %2827  ;;  %v1666_v51 = vmul.f32 %v1663_v8, %v1658_v43 }
0x12d4   :  { %v1659_v47 = vmul.f32 %v2828_v0, %v1627_v33  ;;  %v3351_v50 = vadd.f32 %v1671_v42, %v1665_v44 }
0x12d5   :  { %v3356_v57 = vadd.f32 %v1671_v42, %v1666_v51  ;;  %v1786_v51 = vrot.slane %v3224_v36, %v888_v13 }
0x12d6   :  { %v1676_v49 = vpack.c.bf16 %v3351_v50, %v3349_v48  ;;  %v1667_v10 = vmul.f32 %v1663_v8, %v1659_v47 }
0x12d8   :  { %2661 = vmatprep.mubr.msk.bf16.mxu1 %vm54_vm0, %v1676_v49  ;;  %v3358_v46 = vadd.f32 %v1671_v42, %v1667_v10 }
0x12da   :  { %v1677_v52 = vpack.c.bf16 %v3358_v46, %v3356_v57 }
0x12dc   :  { %2662 = vmatmul.mubr.msk.bf16.vlgmr.msra.gmra.mxu1 %vm54_vm0, %v1677_v52 }
0x139c   :  { %v2663_v2 = vpop.f32.mrf.mxu1 }
0x139d   :  { %v1739_v29 = vadd.f32 %v2663_v2, %v1681_v25 }
0x139e   :  { %v1730_v4 = vpop.f32.mrf.mxu1 }
0x139f   :  { %v1747_v5 = vmul.f32 %v1739_v29, %v1739_v29  ;;  %v1731_v34 = vadd.f32 %v1730_v4, %v1681_v25 }
0x13a0   :  { %v2664_v9 = vpop.f32.mrf.mxu1 }
0x13a1   :  { %v1751_v27 = vmul.f32 %v1747_v5, %v1739_v29  ;;  %v1745_v26 = vmul.f32 %v1731_v34, %v1731_v34  ;;  %v1742_v59 = vadd.f32 %v2664_v9, %v1681_v25 }
0x13a2   :  { %v1733_v16 = vpop.f32.mrf.mxu1 }
0x13a3   :  { %v1755_v45 = vmul.f32 0.044715, %v1751_v27  ;;  %v1749_v35 = vmul.f32 %v1745_v26, %v1731_v34  ;;  %v1748_v7 = vmul.f32 %v1742_v59, %v1742_v59  ;;  %v1734_v55 = vadd.f32 %v1733_v16, %v1681_v25 }
0x13a5   :  { %v1759_v33 = vadd.f32 %v1755_v45, %v1739_v29  ;;  %v1753_v19 = vmul.f32 0.044715, %v1749_v35  ;;  %v1752_v56 = vmul.f32 %v1748_v7, %v1742_v59  ;;  %v1746_v18 = vmul.f32 %v1734_v55, %v1734_v55 }
0x13a7   :  { %v1763_v38 = vmul.f32 0.7978846, %v1759_v33  ;;  %v1757_v15 = vadd.f32 %v1753_v19, %v1731_v34  ;;  %v1756_v20 = vmul.f32 0.044715, %v1752_v56  ;;  %v1750_v17 = vmul.f32 %v1746_v18, %v1734_v55 }
0x13a9   :  { %v1761_v60 = vmul.f32 0.7978846, %v1757_v15  ;;  %v1760_v21 = vadd.f32 %v1756_v20, %v1742_v59  ;;  %v1754_v24 = vmul.f32 0.044715, %v1750_v17  ;;  %2829 = vtanh.f32 %v1763_v38 }
0x13ab   :  { %2831 = vtanh.f32 %v1761_v60  ;;  %v1764_v22 = vmul.f32 0.7978846, %v1760_v21  ;;  %v1758_v23 = vadd.f32 %v1754_v24, %v1734_v55  ;;  %v2721_v21 = vld [vmem:[%s3557_s6 + $0x8] sm:$0xff]   ;;  %v2861_v24 = vmov 0.0  }
0x13ac   :  { %2673 = vmatprep.subr.bf16.mxu1 %v2861_v24  ;;  %2677 = vmatprep.mubr.msk.bf16.mxu1 %vm2862_vm3, %v2861_v24 }
0x13ad   :  { %2833 = vtanh.f32 %v1764_v22  ;;  %v1762_v30 = vmul.f32 0.7978846, %v1758_v23  ;;  %2674 = vmatpush3.bf16.msra.mxu1 %v2721_v21  ;;  %v2722_v22 = vld [vmem:[%s3557_s6] sm:$0xff]   ;;  %v2159_v21 = vld [vmem:[%s3560_s11 + $0x8] sm:$0xff] }
0x13ae   :  { %2675 = vmatprep.subr.bf16.mxu1 %v2861_v24 }
0x13af   :  { %2835 = vtanh.f32 %v1762_v30 }
0x13b1   :  { %2676 = vmatpush3.bf16.msra.mxu1 %v2722_v22  ;;  %v2158_v22 = vld [vmem:[%s3560_s11] sm:$0xff] }
0x13b2   :  { %2681 = vmatprep.subr.bf16.mxu1 %v2861_v24 }
0x13b6   :  { %v2830_v31 = vpop.eup %2829 }
0x13b7   :  { %v1771_v53 = vadd.f32 1.0, %v2830_v31 }
0x13b8   :  { %v2832_v28 = vpop.eup %2831 }
0x13b9   :  { %v1769_v32 = vadd.f32 1.0, %v2832_v28  ;;  %v1775_v40 = vmul.f32 0.5, %v1771_v53 }
0x13ba   :  { %v2834_v6 = vpop.eup %2833 }
0x13bb   :  { %v1772_v14 = vadd.f32 1.0, %v2834_v6  ;;  %v1773_v37 = vmul.f32 0.5, %v1769_v32  ;;  %v1779_v44 = vmul.f32 %v1775_v40, %v1739_v29  ;;  %v1911_v40 = vrot.slane %v3224_v36, %v1014_v11 }
0x13bc   :  { %v2836_v1 = vpop.eup %2835 }
0x13bd   :  { %v1776_v8 = vmul.f32 0.5, %v1772_v14  ;;  %v1770_v39 = vadd.f32 1.0, %v2836_v1  ;;  %v1777_v42 = vmul.f32 %v1773_v37, %v1731_v34 }
0x13bf   :  { %v1774_v3 = vmul.f32 0.5, %v1770_v39  ;;  %v1780_v41 = vmul.f32 %v1776_v8, %v1742_v59 }
0x13c1   :  { %v1778_v43 = vmul.f32 %v1774_v3, %v1734_v55  ;;  %v1782_v47 = vpack.c.bf16 %v1780_v41, %v1779_v44  ;;  %v1919_v41 = vrot.slane %v3224_v36, %v1022_v54 }
0x13c3   :  { %v1781_v0 = vpack.c.bf16 %v1778_v43, %v1777_v42 }
0x13c5   :  { %2669 = vmatprep.mubr.msk.bf16.mxu0 %vm894_vm2, %v1781_v0 }
0x13c6   :  { %2670 = vmatmul.mubr.msk.bf16.vlgmr.msra.gmra.mxu0 %vm894_vm2, %v1782_v47 }
0x13c7   :  { %2151 = vmatprep.mubr.f32.mxu0 %v2861_v24 }
0x1486   :  { %v2671_v49 = vpop.f32.mrf.mxu0 }
0x1487   :  { %v1846_v10 = vadd.f32 %v2671_v49, %v1786_v51 }
0x1488   :  { %v1837_v52 = vpop.f32.mrf.mxu0 }
0x1489   :  { %v1838_v58 = vadd.f32 %v1837_v52, %v1786_v51  ;;  %v1854_v61 = vadd.f32 %v1846_v10, %v3356_v57 }
0x148a   :  { %v2672_v12 = vpop.f32.mrf.mxu0 }
0x148b   :  { %v1862_v62 = vsel %vm54_vm0, %v1854_v61, 0.0  ;;  %v1852_v25 = vadd.f32 %v1838_v58, %v3349_v48  ;;  %v1849_v29 = vadd.f32 %v2672_v12, %v1786_v51 }
0x148c   :  { %1863 = vadd.xlane.f32.xlu0 %v1862_v62  ;;  %v1840_v2 = vpop.f32.mrf.mxu0 }
0x148d   :  { %v1841_v4 = vadd.f32 %v1840_v2, %v1786_v51  ;;  %v1856_v5 = vsel %vm54_vm0, %v1852_v25, 0.0  ;;  %v1855_v9 = vadd.f32 %v1849_v29, %v3358_v46 }
0x148f   :  { %v1853_v34 = vadd.f32 %v1841_v4, %v3351_v50  ;;  %v1865_v57 = vsel %vm54_vm0, %v1855_v9, 0.0 }
0x1490   :  { %1857 = vadd.xlane.f32.xlu0 %v1856_v5 }
0x1491   :  { %v1859_v13 = vsel %vm54_vm0, %v1853_v34, 0.0 }
0x1492   :  { %1860 = vadd.xlane.f32.xlu1 %v1859_v13 }
0x1496   :  { %1866 = vadd.xlane.f32.xlu1 %v1865_v57 }
0x1515   :  { %v1864_v27 = vpop.xlane.xlu0 %1863 }
0x1516   :  { %v1870_v26 = vmul.f32 0.03125, %v1864_v27 }
0x1518   :  { %v1874_v48 = vsub.f32 %v1854_v61, %v1870_v26 }
0x1519   :  { %v1858_v59 = vpop.xlane.xlu0 %1857 }
0x151a   :  { %v1868_v16 = vmul.f32 0.03125, %v1858_v59  ;;  %v1878_v45 = vmul.f32 %v1874_v48, %v1874_v48 }
0x151b   :  { %v1861_v35 = vpop.xlane.xlu1 %1860 }
0x151c   :  { %v1869_v7 = vmul.f32 0.03125, %v1861_v35  ;;  %v1886_v55 = vsel %vm54_vm0, %v1878_v45, 0.0  ;;  %v1872_v50 = vsub.f32 %v1852_v25, %v1868_v16  ;;  %v2723_v16 = vld [vmem:[%s3558_s8 + $0x8] sm:$0xff]   ;;  %v2724_v45 = vld [vmem:[%s3558_s8] sm:$0xff]   ;;  %v2083_v35 = vld [vmem:[%s3559_s10 + $0x18] sm:$0xff] }
0x151d   :  { %1887 = vadd.xlane.f32.xlu1 %v1886_v55  ;;  %v2082_v55 = vld [vmem:[%s3559_s10 + $0x10] sm:$0xff]  ;;  %2115 = vmatprep.subr.mxu0 %v2083_v35 }
0x151e   :  { %v1873_v33 = vsub.f32 %v1853_v34, %v1869_v7  ;;  %v1876_v15 = vmul.f32 %v1872_v50, %v1872_v50  ;;  %v2161_v7 = vld [vmem:[%s3560_s11 + $0x18] sm:$0xff]  ;;  %2116 = vmatpush1.msra.mxu0 %v2082_v55 }
0x151f   :  { %v1867_v19 = vpop.xlane.xlu1 %1866 }
0x1520   :  { %v1871_v56 = vmul.f32 0.03125, %v1867_v19  ;;  %v1877_v46 = vmul.f32 %v1873_v33, %v1873_v33  ;;  %v1880_v60 = vsel %vm54_vm0, %v1876_v15, 0.0 }
0x1522   :  { %v1875_v18 = vsub.f32 %v1855_v9, %v1871_v56  ;;  %v1883_v38 = vsel %vm54_vm0, %v1877_v46, 0.0 }
0x1523   :  { %1884 = vadd.xlane.f32.xlu0 %v1883_v38 }
0x1524   :  { %v1879_v20 = vmul.f32 %v1875_v18, %v1875_v18 }
0x1526   :  { %v1889_v17 = vsel %vm54_vm0, %v1879_v20, 0.0  ;;  %v2160_v20 = vld [vmem:[%s3560_s11 + $0x10] sm:$0xff] }
0x1527   :  { %1890 = vadd.xlane.f32.xlu1 %v1889_v17  ;;  %1881 = vadd.xlane.f32.xlu0 %v1880_v60  ;;  %v2081_v17 = vld [vmem:[%s3559_s10 + $0x8] sm:$0xff]  ;;  %v2080_v60 = vld [vmem:[%s3559_s10] sm:$0xff] }
0x1528   :  { %2117 = vmatprep.subr.mxu0 %v2081_v17 }
0x1529   :  { %2118 = vmatpush1.msra.mxu0 %v2080_v60 }
0x15a6   :  { %v1888_v23 = vpop.xlane.xlu1 %1887 }
0x15a7   :  { %v1894_v30 = vmul.f32 0.03125, %v1888_v23  ;;  %v2421_v23 = vld [vmem:[%s3563_s9] ss:$0 sm:$0xff] }
0x15a9   :  { %v1898_v31 = vadd.f32 1e-12, %v1894_v30 }
0x15ab   :  { %2837 = vrsqrt.f32 %v1898_v31 }
0x15ac   :  { %v1885_v28 = vpop.xlane.xlu0 %1884 }
0x15ad   :  { %v1893_v32 = vmul.f32 0.03125, %v1885_v28  ;;  %v2253_v28 = vld [vmem:[%s3562_s12 + $0x78] sm:$0xff] }
0x15af   :  { %v1897_v6 = vadd.f32 1e-12, %v1893_v32 }
0x15b0   :  { %v1891_v53 = vpop.xlane.xlu1 %1890  ;;  %v1882_v14 = vpop.xlane.xlu0 %1881 }
0x15b1   :  { %2839 = vrsqrt.f32 %v1897_v6  ;;  %v1895_v1 = vmul.f32 0.03125, %v1891_v53  ;;  %v1892_v37 = vmul.f32 0.03125, %v1882_v14  ;;  %v2268_v6 = vld [vmem:[%s3562_s12 + $0xf0] sm:$0xff] }
0x15b2   :  { %v2252_v14 = vld [vmem:[%s3562_s12 + $0x70] sm:$0xff] }
0x15b3   :  { %v1899_v8 = vadd.f32 1e-12, %v1895_v1  ;;  %v1896_v39 = vadd.f32 1e-12, %v1892_v37  ;;  %v2267_v37 = vld [vmem:[%s3562_s12 + $0xe8] sm:$0xff] }
0x15b5   :  { %2841 = vrsqrt.f32 %v1899_v8  ;;  %v2251_v8 = vld [vmem:[%s3562_s12 + $0x68] sm:$0xff] }
0x15b6   :  { %2843 = vrsqrt.f32 %v1896_v39 }
0x15b8   :  { %v2838_v3 = vpop.eup %2837 }
0x15b9   :  { %v1906_v42 = vmul.f32 %v2838_v3, %v1874_v48  ;;  %v2250_v3 = vld [vmem:[%s3562_s12 + $0x60] sm:$0xff] }
0x15bb   :  { %v1914_v43 = vmul.f32 %v1911_v40, %v1906_v42  ;;  %v2249_v42 = vld [vmem:[%s3562_s12 + $0x58] sm:$0xff] }
0x15bd   :  { %v1922_v44 = vadd.f32 %v1919_v41, %v1914_v43  ;;  %v2264_v43 = vld [vmem:[%s3562_s12 + $0xd0] sm:$0xff] }
0x15be   :  { %v2840_v0 = vpop.eup %2839 }
0x15bf   :  { %v1905_v47 = vmul.f32 %v2840_v0, %v1873_v33  ;;  %v1926_v25 = vpack.c.bf16 %v1922_v44, %v1922_v44  ;;  %v2248_v44 = vld [vmem:[%s3562_s12 + $0x50] sm:$0xff]  ;;  %v2263_v0 = vld [vmem:[%s3562_s12 + $0xc8] sm:$0xff] }
0x15c1   :  { %v1913_v51 = vmul.f32 %v1911_v40, %v1905_v47  ;;  %v1945_v54 = vunpack.c.l.b16 %v1926_v25  ;;  %v2247_v47 = vld [vmem:[%s3562_s12 + $0x48] sm:$0xff]  ;;  %v2258_v25 = vld [vmem:[%s3562_s12 + $0xa0] sm:$0xff] }
0x15c2   :  { %v2842_v49 = vpop.eup %2841 }
0x15c3   :  { %v2844_v10 = vpop.eup %2843  ;;  %v1921_v52 = vadd.f32 %v1919_v41, %v1913_v51  ;;  %v1907_v58 = vmul.f32 %v2842_v49, %v1875_v18  ;;  %v1950_v9 = vrot.slane %v1945_v54, 6  ;;  %v2262_v51 = vld [vmem:[%s3562_s12 + $0xc0] sm:$0xff]  ;;  %v2255_v54 = vld [vmem:[%s3562_s12 + $0x88] sm:$0xff] }
0x15c4   :  { %v1904_v61 = vmul.f32 %v2844_v10, %v1872_v50  ;;  %v2417_v50 = vld [vmem:[%s3561_s7] ss:$0 sm:$0xff]  ;;  %v2261_v10 = vld [vmem:[%s3562_s12 + $0xb8] sm:$0xff] }
0x15c5   :  { %v1925_v12 = vpack.c.bf16 %v1921_v52, %v1921_v52  ;;  %v1915_v62 = vmul.f32 %v1911_v40, %v1907_v58  ;;  %v2246_v49 = vld [vmem:[%s3562_s12 + $0x40] sm:$0xff]  ;;  %v2245_v52 = vld [vmem:[%s3562_s12 + $0x38] sm:$0xff]  ;;  %v2260_v58 = vld [vmem:[%s3562_s12 + $0xb0] sm:$0xff] }
0x15c6   :  { %v1912_v11 = vmul.f32 %v1911_v40, %v1904_v61  ;;  %v2266_v40 = vld [vmem:[%s3562_s12 + $0xe0] sm:$0xff]  ;;  %v2244_v61 = vld [vmem:[%s3562_s12 + $0x30] sm:$0xff] }
0x15c7   :  { %v1923_v2 = vadd.f32 %v1919_v41, %v1915_v62  ;;  %v1944_v29 = vunpack.c.l.b16 %v1925_v12  ;;  %v2259_v12 = vld [vmem:[%s3562_s12 + $0xa8] sm:$0xff] }
0x15c8   :  { %v1920_v63 = vadd.f32 %v1919_v41, %v1912_v11  ;;  %v2265_v41 = vld [vmem:[%s3562_s12 + $0xd8] sm:$0xff]  ;;  %v2243_v62 = vld [vmem:[%s3562_s12 + $0x28] sm:$0xff]  ;;  %v2242_v11 = vld [vmem:[%s3562_s12 + $0x20] sm:$0xff] }
0x15c9   :  { %v1927_v4 = vpack.c.bf16 %v1923_v2, %v1923_v2  ;;  %v1947_v34 = vrot.slane %v1944_v29, 7  ;;  %v2257_v2 = vld [vmem:[%s3562_s12 + $0x98] sm:$0xff] }
0x15ca   :  { %v1924_v36 = vpack.c.bf16 %v1920_v63, %v1920_v63  ;;  %v2241_v29 = vld [vmem:[%s3562_s12 + $0x18] sm:$0xff]  ;;  %v2256_v63 = vld [vmem:[%s3562_s12 + $0x90] sm:$0xff] }
0x15cb   :  { %v1946_v5 = vunpack.c.l.b16 %v1927_v4  ;;  %v2240_v4 = vld [vmem:[%s3562_s12 + $0x10] sm:$0xff] }
0x15cc   :  { %v1943_v13 = vunpack.c.l.b16 %v1924_v36  ;;  %v2239_v36 = vld [vmem:[%s3562_s12 + $0x8] sm:$0xff] }
0x15cd   :  { %v1953_v57 = vrot.slane %v1946_v5, 5  ;;  %v2254_v5 = vld [vmem:[%s3562_s12 + $0x80] sm:$0xff] }
0x15ce   :  { %v1949_v27 = vsel %vm1948_vm4, %v1947_v34, %v1943_v13  ;;  %v2238_v34 = vld [vmem:[%s3562_s12] sm:$0xff] }
0x15cf   :  { %v1952_v26 = vsel %vm1951_vm5, %v1950_v9, %v1949_v27 }
0x15d0   :  { %v1955_v48 = vsel %vm1954_vm6, %v1953_v57, %v1952_v26 }
0x15d1   :  { %v1956_v59 = vpack.c.b16 %v1955_v48, %v1955_v48 }
0x15d3   :  { %2678 = vmatmul.mubr.msk.bf16.vlgmr.msra.gmra.mxu1 %vm54_vm0, %v1956_v59 }
0x15d4   :  { %2685 = vmatprep.mubr.msk.bf16.mxu1 %vm2862_vm3, %v2861_v24  ;;  %2682 = vmatpush3.bf16.msra.mxu1 %v2723_v16  ;;  %v2427_v16 = vld [vmem:[%s3564_s13] ss:$0 sm:$0xff] }
0x15d5   :  { %2683 = vmatprep.subr.bf16.mxu1 %v2861_v24 }
0x15d8   :  { %2684 = vmatpush3.bf16.msra.mxu1 %v2724_v45 }
0x15d9   :  { %2193 = vmatprep.subr.mxu1 %v2161_v7 }
0x1693   :  { %v2006_v33 = vpop.f32.mrf.mxu1 }
0x1694   :  { %v2007_v19 = vadd.f32 %v2417_v50, %v2006_v33 }
0x1695   :  { %v2679_v56 = vpop.f32.mrf.mxu1 }
0x1696   :  { %2845 = vtanh.f32 %v2007_v19 }
0x1697   :  { %v2009_v46 = vpop.f32.mrf.mxu1 }
0x1699   :  { %v2680_v18 = vpop.f32.mrf.mxu1 }
0x16a3   :  { %v2846_v38 = vpop.eup %2845 }
0x16a4   :  { %v2013_v15 = vpack.c.bf16 %v2846_v38, %v2846_v38 }
0x16a6   :  { %2686 = vmatmul.mubr.msk.bf16.vlgmr.msra.gmra.mxu1 %vm54_vm0, %v2013_v15 }
0x16a7   :  { %2194 = vmatpush1.msra.mxu1 %v2160_v20  ;;  %2229 = vmatprep.mubr.f32.mxu1 %v2861_v24  ;;  %v2269_v24 = vld [vmem:[%s3562_s12 + $0xf8] sm:$0xff] }
0x16a8   :  { %2195 = vmatprep.subr.mxu1 %v2159_v21  ;;  %2502 = vmatprep.subr.mxu0 %v2269_v24 }
0x16a9   :  { %2196 = vmatpush1.msra.mxu1 %v2158_v22 }
0x1766   :  { %v2074_v30 = vpop.f32.mrf.mxu1 }
0x1767   :  { %v2075_v31 = vadd.f32 %v2421_v23, %v2074_v30 }
0x1768   :  { %v2687_v32 = vpop.f32.mrf.mxu1 }
0x1769   :  { %v2162_v53 = vrot.slane %v2075_v31, 2  ;;  %2425 = vmatmul.mubr.msk.f32.vlgmr.msra.gmra.mxu0 %vm218_vm1, %v2075_v31 }
0x176a   :  { %v2077_v1 = vpop.f32.mrf.mxu1  ;;  %2503 = vmatpush3.msra.mxu0 %v2253_v28 }
0x176b   :  { %2426 = vmatmul.mubr.msk.f32.vlgmr.msra.gmra.mxu1 %vm218_vm1, %v2162_v53  ;;  %2504 = vmatprep.subr.mxu0 %v2268_v6 }
0x176c   :  { %v2688_v39 = vpop.f32.mrf.mxu1  ;;  %2505 = vmatpush3.msra.mxu0 %v2252_v14 }
0x176d   :  { %2506 = vmatprep.subr.mxu0 %v2267_v37 }
0x176e   :  { %2507 = vmatpush3.msra.mxu0 %v2251_v8 }
0x176f   :  { %2508 = vmatprep.subr.mxu0 %v2266_v40 }
0x1770   :  { %2509 = vmatpush3.msra.mxu0 %v2250_v3 }
0x1771   :  { %2510 = vmatprep.subr.mxu0 %v2265_v41 }
0x1772   :  { %2511 = vmatpush3.msra.mxu0 %v2249_v42 }
0x1773   :  { %2512 = vmatprep.subr.mxu0 %v2264_v43 }
0x1774   :  { %2513 = vmatpush3.msra.mxu0 %v2248_v44 }
0x1775   :  { %2514 = vmatprep.subr.mxu0 %v2263_v0 }
0x1776   :  { %2515 = vmatpush3.msra.mxu0 %v2247_v47 }
0x1777   :  { %2516 = vmatprep.subr.mxu0 %v2262_v51 }
0x1778   :  { %2517 = vmatpush3.msra.mxu0 %v2246_v49 }
0x1779   :  { %2518 = vmatprep.subr.mxu0 %v2261_v10 }
0x177a   :  { %2519 = vmatpush3.msra.mxu0 %v2245_v52 }
0x177b   :  { %2520 = vmatprep.subr.mxu0 %v2260_v58 }
0x177c   :  { %2521 = vmatpush3.msra.mxu0 %v2244_v61 }
0x177d   :  { %2522 = vmatprep.subr.mxu0 %v2259_v12 }
0x177e   :  { %2523 = vmatpush3.msra.mxu0 %v2243_v62 }
0x177f   :  { %2524 = vmatprep.subr.mxu0 %v2258_v25 }
0x1780   :  { %2525 = vmatpush3.msra.mxu0 %v2242_v11 }
0x1781   :  { %2526 = vmatprep.subr.mxu0 %v2257_v2 }
0x1782   :  { %2527 = vmatpush3.msra.mxu0 %v2241_v29 }
0x1783   :  { %2528 = vmatprep.subr.mxu0 %v2256_v63 }
0x1784   :  { %2529 = vmatpush3.msra.mxu0 %v2240_v4 }
0x1785   :  { %2530 = vmatprep.subr.mxu0 %v2255_v54 }
0x1786   :  { %2531 = vmatpush3.msra.mxu0 %v2239_v36 }
0x1787   :  { %2532 = vmatprep.subr.mxu0 %v2254_v5 }
0x1788   :  { %2533 = vmatpush3.msra.mxu0 %v2238_v34 }
0x1829   :  { %v2153_v13 = vpop.f32.mrf.mxu0 }
0x182b   :  { %v2231_v9 = vpop.f32.mrf.mxu1  ;;  %v2155_v57 = vpop.f32.mrf.mxu0 }
0x182c   :  { %v2236_v48 = vmul.f32 %v2231_v9, %v2153_v13 }
0x182d   :  { %v2233_v27 = vpop.f32.mrf.mxu1 }
0x182e   :  { %v2237_v26 = vmul.f32 %v2233_v27, %v2155_v57 }
0x1830   :  { %2341 = vmatprep.mubr.f32.mxu0 %v2237_v26 }
0x1831   :  { %2342 = vmatmul.mubr.f32.vlgmr.msra.gmra.mxu0 %v2236_v48 }
0x18f1   :  { %v2534_v59 = vpop.f32.mrf.mxu0 }
0x18f3   :  { %v2535_v45 = vpop.f32.mrf.mxu0 }
0x18f4   :  { %v2536_v35 = vadd.f32 %v2535_v45, %v2534_v59 }
0x18f6   :  { %v2344_v7 = vadd.f32 %v2536_v35, %v2427_v16 }
0x18f8   :  { %v2348_v55 = vsel %vm2347_vm7, %v2344_v7, -inf }
0x18f9   :  { %2349 = vmax.xlane.f32.xlu0 %v2348_v55 }
0x1982   :  { %v2350_v50 = vpop.xlane.xlu0 %2349 }
0x1983   :  { %v2351_v33 = vsub.f32 %v2344_v7, %v2350_v50 }
0x1985   :  { %v2352_v19 = vmul.f32 1.442695, %v2351_v33 }
0x1987   :  { %2847 = vpow2.f32 %v2352_v19 }
0x1994   :  { %v2848_v56 = vpop.eup %2847 }
0x1995   :  { %v2354_v46 = vsel %vm2347_vm7, %v2848_v56, 0.0 }
0x1996   :  { %2355 = vadd.xlane.f32.xlu1 %v2354_v46 }
0x1a1f   :  { %v2356_v18 = vpop.xlane.xlu1 %2355 }
0x1a20   :  { %2849 = vlog2.f32 %v2356_v18 }
0x1a2d   :  { %v2850_v38 = vpop.eup %2849 }
0x1a2e   :  { %v2358_v15 = vmul.f32 0.6931472, %v2850_v38 }
0x1a30   :  { %v2359_v20 = vadd.f32 %v2358_v15, %v2350_v50 }
0x1a32   :  { %v2360_v17 = vsub.f32 %v2344_v7, %v2359_v20 }
0x1a34   :  { %2361 = vst [vmem:[%s3565_s14] sm:$0x3] %v2360_v17 }

</bundles_post_ra>
